<compile_context>
chip_gen: v7x
topology: tpu7x:2x2x1
jax: 0.10.0
libtpu: 0.0.40
codegen_flags: <defaults>
</compile_context>

<pallas_src>
import functools

import jax
import jax.numpy as jnp
from jax import lax
from jax.experimental import pallas as pl
from jax.experimental.pallas import tpu as pltpu

N_CHANNELS = 3

_LANE = 128          # lane width: pad K and Cout to multiples of this
_TM_MAX = 512        # rows per grid step (≈85% of HBM roofline on v6e)
_CHUNK_ROWS = 128    # rows per in-kernel matmul chunk (bounds vreg pressure)
_VMEM_LIMIT = 32 * 1024 * 1024


def _round_up(x, m):
    return ((x + m - 1) // m) * m


def _pad2d(a, rows, cols):
    r, c = a.shape
    if r == rows and c == cols:
        return a
    return jnp.pad(a, ((0, rows - r), (0, cols - c)))


# ------------------------------ Pallas kernels ------------------------------
def _mm_stats_kernel(x_ref, w_ref, y_ref, sum_ref, ssq_ref, *, n_chunks, rows):
    """Per-M-tile matmul (bf16 MXU, f32 accum) + per-channel sum / sum-of-sq.

    sum/ssq outputs keep the same block across the whole (arbitrary) M grid
    axis, so they act as resident accumulators (zeroed at step 0).
    """
    @pl.when(pl.program_id(0) == 0)
    def _init():
        sum_ref[...] = jnp.zeros_like(sum_ref)
        ssq_ref[...] = jnp.zeros_like(ssq_ref)

    def body(c, carry):
        r0 = pl.multiple_of(c * rows, rows)
        yc = jnp.dot(x_ref[pl.ds(r0, rows), :], w_ref[...],
                     preferred_element_type=jnp.float32)
        y_ref[pl.ds(r0, rows), :] = yc
        sum_ref[...] += jnp.sum(yc, axis=0, keepdims=True)
        ssq_ref[...] += jnp.sum(yc * yc, axis=0, keepdims=True)
        return carry

    lax.fori_loop(0, n_chunks, body, 0, unroll=True)


def _mm_act_kernel(x_ref, w_ref, y_ref, *, n_chunks, rows, use_lrelu):
    """Per-M-tile matmul (bf16 MXU, f32 accum) + optional LeakyReLU(0.2)."""
    def body(c, carry):
        r0 = pl.multiple_of(c * rows, rows)
        yc = jnp.dot(x_ref[pl.ds(r0, rows), :], w_ref[...],
                     preferred_element_type=jnp.float32)
        if use_lrelu:
            yc = jnp.maximum(yc, 0.2 * yc)   # LeakyReLU(0.2)
        y_ref[pl.ds(r0, rows), :] = yc
        return carry

    lax.fori_loop(0, n_chunks, body, 0, unroll=True)


def _bn_act_kernel(y_ref, scale_ref, shift_ref, o_ref):
    """Folded BatchNorm (y*scale + shift) + LeakyReLU(0.2), f32 VPU math."""
    y = y_ref[...] * scale_ref[...] + shift_ref[...]
    o_ref[...] = jnp.maximum(y, 0.2 * y)


# --------------------------- fused conv layer glue ---------------------------
def conv_layer(x_nhwc, w_oihw, gamma=None, beta=None, *, stride, pad,
               use_bn, use_lrelu, eps=1e-5):
    """Conv2d (bias=False) [+ training-mode BatchNorm] [+ LeakyReLU(0.2)]."""
    Cout, Cin, kh, kw = w_oihw.shape
    N, H, W, _ = x_nhwc.shape
    OH = (H + 2 * pad - kh) // stride + 1
    OW = (W + 2 * pad - kw) // stride + 1
    M = N * OH * OW
    K = Cin * kh * kw

    # Patch extraction fused into one XLA op, in bf16 (half the HBM bytes).
    # Feature ordering of the patches is (Cin, kh, kw) row-major.
    xb = x_nhwc.astype(jnp.bfloat16)
    patches = lax.conv_general_dilated_patches(
        xb, filter_shape=(kh, kw), window_strides=(stride, stride),
        padding=[(pad, pad), (pad, pad)],
        dimension_numbers=("NHWC", "HWIO", "NHWC"))
    x2d = patches.reshape(M, K).astype(jnp.bfloat16)
    w2d = jnp.transpose(w_oihw, (1, 2, 3, 0)).reshape(K, Cout).astype(jnp.bfloat16)

    # Lane/tile padding (padded K rows & Cout columns are zero -> no effect).
    K_pad = _round_up(K, _LANE)
    C_pad = _round_up(Cout, _LANE)
    TM = _TM_MAX if M >= _TM_MAX else _round_up(M, 16)
    M_pad = _round_up(M, TM)
    rows = _CHUNK_ROWS if TM % _CHUNK_ROWS == 0 else TM
    n_chunks = TM // rows
    grid = (M_pad // TM,)

    x2d = _pad2d(x2d, M_pad, K_pad)
    w2d = _pad2d(w2d, K_pad, C_pad)

    x_spec = pl.BlockSpec((TM, K_pad), lambda i: (i, 0))
    w_spec = pl.BlockSpec((K_pad, C_pad), lambda i: (0, 0))
    y_spec = pl.BlockSpec((TM, C_pad), lambda i: (i, 0))
    vec_spec = pl.BlockSpec((1, C_pad), lambda i: (0, 0))

    cost = pl.CostEstimate(
        flops=2 * M_pad * K_pad * C_pad,
        transcendentals=0,
        bytes_accessed=int(x2d.size * 2 + w2d.size * 2 + M_pad * C_pad * 4))

    if use_bn:
        # ---- pass 1: matmul + per-channel sum / sum-of-squares accumulation
        y_pad, s_sum, s_ssq = pl.pallas_call(
            functools.partial(_mm_stats_kernel, n_chunks=n_chunks, rows=rows),
            out_shape=(jax.ShapeDtypeStruct((M_pad, C_pad), jnp.float32),
                       jax.ShapeDtypeStruct((1, C_pad), jnp.float32),
                       jax.ShapeDtypeStruct((1, C_pad), jnp.float32)),
            grid=grid,
            in_specs=[x_spec, w_spec],
            out_specs=(y_spec, vec_spec, vec_spec),
            compiler_params=pltpu.CompilerParams(
                dimension_semantics=("arbitrary",),
                vmem_limit_bytes=_VMEM_LIMIT),
            cost_estimate=cost,
        )(x2d, w2d)

        # Tiny per-channel math in plain JAX; gamma/beta folded into one FMA.
        if gamma is None:
            gamma = jnp.ones((Cout,), jnp.float32)
        if beta is None:
            beta = jnp.zeros((Cout,), jnp.float32)
        mean = s_sum[0] / jnp.float32(M)
        var = jnp.maximum(s_ssq[0] / jnp.float32(M) - mean * mean, 0.0)
        gamma_p = jnp.pad(gamma.astype(jnp.float32), (0, C_pad - Cout),
                          constant_values=1.0)
        beta_p = jnp.pad(beta.astype(jnp.float32), (0, C_pad - Cout))
        scale = gamma_p * lax.rsqrt(var + eps)
        shift = beta_p - mean * scale

        # ---- pass 2: normalize + LeakyReLU, parallel over M tiles
        y_pad = pl.pallas_call(
            _bn_act_kernel,
            out_shape=jax.ShapeDtypeStruct((M_pad, C_pad), jnp.float32),
            grid=grid,
            in_specs=[y_spec, vec_spec, vec_spec],
            out_specs=y_spec,
            compiler_params=pltpu.CompilerParams(
                dimension_semantics=("parallel",),
                vmem_limit_bytes=_VMEM_LIMIT),
        )(y_pad, scale.reshape(1, C_pad), shift.reshape(1, C_pad))
    else:
        y_pad = pl.pallas_call(
            functools.partial(_mm_act_kernel, n_chunks=n_chunks, rows=rows,
                              use_lrelu=use_lrelu),
            out_shape=jax.ShapeDtypeStruct((M_pad, C_pad), jnp.float32),
            grid=grid,
            in_specs=[x_spec, w_spec],
            out_specs=y_spec,
            compiler_params=pltpu.CompilerParams(
                dimension_semantics=("parallel",),
                vmem_limit_bytes=_VMEM_LIMIT),
            cost_estimate=cost,
        )(x2d, w2d)

    # Strip lane/row padding before it can feed the next layer.
    return y_pad[:M, :Cout].reshape(N, OH, OW, Cout)


# ------------------------------ Discriminator -------------------------------
def init_discriminator_weights(key, n_layers, image_dim, max_mult=8):
    """Deterministic DCGAN-style init: conv weights ~ N(0, 0.02), OIHW layout."""
    channel_pairs = [(N_CHANNELS, image_dim)]
    for layer in range(1, n_layers + 1):
        cin = image_dim * min(2 ** (layer - 1), max_mult)
        cout = image_dim * min(2 ** layer, max_mult)
        channel_pairs.append((cin, cout))
    cfin = image_dim * min(2 ** n_layers, max_mult)
    channel_pairs.append((cfin, 1))
    weights = []
    for cin, cout in channel_pairs:
        key, sub = jax.random.split(key)
        weights.append(0.02 * jax.random.normal(sub, (cout, cin, 4, 4), jnp.float32))
    return weights


def discriminator_forward(x_nchw, weights, n_layers):
    x = jnp.transpose(x_nchw, (0, 2, 3, 1))  # NCHW -> NHWC
    # first conv + LeakyReLU (no BN)
    x = conv_layer(x, weights[0], stride=2, pad=1, use_bn=False, use_lrelu=True)
    # ConvDiscriminatorCells: conv + BN (training-mode batch stats) + LeakyReLU
    for layer in range(1, n_layers + 1):
        w = weights[layer]
        cout = w.shape[0]
        x = conv_layer(x, w,
                       gamma=jnp.ones((cout,), jnp.float32),
                       beta=jnp.zeros((cout,), jnp.float32),
                       stride=2, pad=1, use_bn=True, use_lrelu=True)
    # final 4x4 conv, stride 1, pad 0, no BN / activation
    x = conv_layer(x, weights[-1], stride=1, pad=0, use_bn=False, use_lrelu=False)
    return jnp.transpose(x, (0, 3, 1, 2))  # NHWC -> NCHW


# ------------------------------ pure-JAX reference ---------------------------
def discriminator_reference(x_nchw, weights, n_layers, eps=1e-5):
    # Matches the kernel's numerics: bf16 conv operands, f32 accumulation.
    def conv(x, w, stride, pad):
        return lax.conv_general_dilated(
            x.astype(jnp.bfloat16), w.astype(jnp.bfloat16), (stride, stride),
            [(pad, pad), (pad, pad)],
            dimension_numbers=("NCHW", "OIHW", "NCHW"),
            preferred_element_type=jnp.float32)

    def bn(x):
        mean = jnp.mean(x, axis=(0, 2, 3), keepdims=True)
        var = jnp.mean(jnp.square(x - mean), axis=(0, 2, 3), keepdims=True)
        return (x - mean) * lax.rsqrt(var + eps)

    def lrelu(x):
        return jnp.where(x >= 0, x, 0.2 * x)

    x = lrelu(conv(x_nchw, weights[0], 2, 1))
    for layer in range(1, n_layers + 1):
        x = lrelu(bn(conv(x, weights[layer], 2, 1)))
    return conv(x, weights[-1], 1, 0)


if __name__ == "__main__":
    # Small config consistent with the module: n_layers=2, image_dim=8.
    # Input 2 x 3 x 32 x 32 -> 32->16->8->4 -> final 4x4 conv -> 2 x 1 x 1 x 1.
    n_layers, image_dim = 2, 8
    key = jax.random.PRNGKey(0)
    kx, kw = jax.random.split(key)
    x = jax.random.normal(kx, (2, N_CHANNELS, 32, 32), jnp.float32)
    weights = init_discriminator_weights(kw, n_layers, image_dim)

    fwd = jax.jit(functools.partial(discriminator_forward, n_layers=n_layers))
    out = jax.block_until_ready(fwd(x, weights))

    ref = jax.block_until_ready(discriminator_reference(x, weights, n_layers))
    assert out.shape == (2, 1, 1, 1), out.shape
    assert jnp.allclose(out, ref, rtol=2e-2, atol=2e-2), (out, ref)
    print("KERNEL_OK")
</pallas_src>

<mosaic_0001>
module attributes {stable_mosaic.version = 11 : i64} {
  func.func @_mm_act_kernel(%arg0: i32, %arg1: memref<512x128xbf16, #tpu.memory_space<vmem>>, %arg2: memref<128x128xbf16, #tpu.memory_space<vmem>>, %arg3: memref<512x128xf32, #tpu.memory_space<vmem>>) attributes {dimension_semantics = [#tpu.dimension_semantics<parallel>], iteration_bounds = array<i64: 1>, scalar_prefetch = 0 : i64, scratch_operands = 0 : i64, tpu.core_type = #tpu.core_type<tc>, window_params = [{transform_indices = @transform_0, window_bounds = array<i64: 512, 128>}, {pipeline_mode = #tpu.pipeline_mode<synchronous>, transform_indices = @transform_1, window_bounds = array<i64: 128, 128>}, {transform_indices = @transform_2, window_bounds = array<i64: 512, 128>}]} {
    %c0_i32 = arith.constant 0 : i32
    %c128_i32 = arith.constant 128 : i32
    %0 = arith.muli %c0_i32, %c128_i32 : i32
    %1 = tpu.assume_multiple %0, 128 : i32
    %2 = arith.index_cast %1 : i32 to index
    %c0 = arith.constant 0 : index
    %3 = vector.load %arg1[%2, %c0] : memref<512x128xbf16, #tpu.memory_space<vmem>>, vector<128x128xbf16>
    %c0_0 = arith.constant 0 : index
    %c0_1 = arith.constant 0 : index
    %4 = vector.load %arg2[%c0_0, %c0_1] : memref<128x128xbf16, #tpu.memory_space<vmem>>, vector<128x128xbf16>
    %cst = arith.constant dense<0.000000e+00> : vector<128x128xf32>
    %5 = tpu.matmul %3, %4, %cst {dimension_numbers = #tpu.dot_dimension_numbers<[1], [0], [0], [1], [0, 0, 1, 1], [], []>} : vector<128x128xbf16>, vector<128x128xbf16>, vector<128x128xf32> -> vector<128x128xf32>
    %cst_2 = arith.constant 2.000000e-01 : f32
    %6 = vector.broadcast %cst_2 : f32 to vector<128x128xf32>
    %7 = arith.mulf %6, %5 : vector<128x128xf32>
    %8 = arith.maximumf %5, %7 : vector<128x128xf32>
    %9 = arith.index_cast %1 : i32 to index
    %c0_3 = arith.constant 0 : index
    %10 = vector.load %arg3[%9, %c0_3] : memref<512x128xf32, #tpu.memory_space<vmem>>, vector<128x128xf32>
    tpu.vector_store %arg3[%9, %c0_3], %8 {strides = array<i32>} : memref<512x128xf32, #tpu.memory_space<vmem>>, vector<128x128xf32>,
    %c1_i32 = arith.constant 1 : i32
    %c128_i32_4 = arith.constant 128 : i32
    %11 = arith.muli %c1_i32, %c128_i32_4 : i32
    %12 = tpu.assume_multiple %11, 128 : i32
    %13 = arith.index_cast %12 : i32 to index
    %c0_5 = arith.constant 0 : index
    %14 = vector.load %arg1[%13, %c0_5] : memref<512x128xbf16, #tpu.memory_space<vmem>>, vector<128x128xbf16>
    %c0_6 = arith.constant 0 : index
    %c0_7 = arith.constant 0 : index
    %15 = vector.load %arg2[%c0_6, %c0_7] : memref<128x128xbf16, #tpu.memory_space<vmem>>, vector<128x128xbf16>
    %cst_8 = arith.constant dense<0.000000e+00> : vector<128x128xf32>
    %16 = tpu.matmul %14, %15, %cst_8 {dimension_numbers = #tpu.dot_dimension_numbers<[1], [0], [0], [1], [0, 0, 1, 1], [], []>} : vector<128x128xbf16>, vector<128x128xbf16>, vector<128x128xf32> -> vector<128x128xf32>
    %cst_9 = arith.constant 2.000000e-01 : f32
    %17 = vector.broadcast %cst_9 : f32 to vector<128x128xf32>
    %18 = arith.mulf %17, %16 : vector<128x128xf32>
    %19 = arith.maximumf %16, %18 : vector<128x128xf32>
    %20 = arith.index_cast %12 : i32 to index
    %c0_10 = arith.constant 0 : index
    %21 = vector.load %arg3[%20, %c0_10] : memref<512x128xf32, #tpu.memory_space<vmem>>, vector<128x128xf32>
    tpu.vector_store %arg3[%20, %c0_10], %19 {strides = array<i32>} : memref<512x128xf32, #tpu.memory_space<vmem>>, vector<128x128xf32>,
    %c2_i32 = arith.constant 2 : i32
    %c128_i32_11 = arith.constant 128 : i32
    %22 = arith.muli %c2_i32, %c128_i32_11 : i32
    %23 = tpu.assume_multiple %22, 128 : i32
    %24 = arith.index_cast %23 : i32 to index
    %c0_12 = arith.constant 0 : index
    %25 = vector.load %arg1[%24, %c0_12] : memref<512x128xbf16, #tpu.memory_space<vmem>>, vector<128x128xbf16>
    %c0_13 = arith.constant 0 : index
    %c0_14 = arith.constant 0 : index
    %26 = vector.load %arg2[%c0_13, %c0_14] : memref<128x128xbf16, #tpu.memory_space<vmem>>, vector<128x128xbf16>
    %cst_15 = arith.constant dense<0.000000e+00> : vector<128x128xf32>
    %27 = tpu.matmul %25, %26, %cst_15 {dimension_numbers = #tpu.dot_dimension_numbers<[1], [0], [0], [1], [0, 0, 1, 1], [], []>} : vector<128x128xbf16>, vector<128x128xbf16>, vector<128x128xf32> -> vector<128x128xf32>
    %cst_16 = arith.constant 2.000000e-01 : f32
    %28 = vector.broadcast %cst_16 : f32 to vector<128x128xf32>
    %29 = arith.mulf %28, %27 : vector<128x128xf32>
    %30 = arith.maximumf %27, %29 : vector<128x128xf32>
    %31 = arith.index_cast %23 : i32 to index
    %c0_17 = arith.constant 0 : index
    %32 = vector.load %arg3[%31, %c0_17] : memref<512x128xf32, #tpu.memory_space<vmem>>, vector<128x128xf32>
    tpu.vector_store %arg3[%31, %c0_17], %30 {strides = array<i32>} : memref<512x128xf32, #tpu.memory_space<vmem>>, vector<128x128xf32>,
    %c3_i32 = arith.constant 3 : i32
    %c128_i32_18 = arith.constant 128 : i32
    %33 = arith.muli %c3_i32, %c128_i32_18 : i32
    %34 = tpu.assume_multiple %33, 128 : i32
    %35 = arith.index_cast %34 : i32 to index
    %c0_19 = arith.constant 0 : index
    %36 = vector.load %arg1[%35, %c0_19] : memref<512x128xbf16, #tpu.memory_space<vmem>>, vector<128x128xbf16>
    %c0_20 = arith.constant 0 : index
    %c0_21 = arith.constant 0 : index
    %37 = vector.load %arg2[%c0_20, %c0_21] : memref<128x128xbf16, #tpu.memory_space<vmem>>, vector<128x128xbf16>
    %cst_22 = arith.constant dense<0.000000e+00> : vector<128x128xf32>
    %38 = tpu.matmul %36, %37, %cst_22 {dimension_numbers = #tpu.dot_dimension_numbers<[1], [0], [0], [1], [0, 0, 1, 1], [], []>} : vector<128x128xbf16>, vector<128x128xbf16>, vector<128x128xf32> -> vector<128x128xf32>
    %cst_23 = arith.constant 2.000000e-01 : f32
    %39 = vector.broadcast %cst_23 : f32 to vector<128x128xf32>
    %40 = arith.mulf %39, %38 : vector<128x128xf32>
    %41 = arith.maximumf %38, %40 : vector<128x128xf32>
    %42 = arith.index_cast %34 : i32 to index
    %c0_24 = arith.constant 0 : index
    %43 = vector.load %arg3[%42, %c0_24] : memref<512x128xf32, #tpu.memory_space<vmem>>, vector<128x128xf32>
    tpu.vector_store %arg3[%42, %c0_24], %41 {strides = array<i32>} : memref<512x128xf32, #tpu.memory_space<vmem>>, vector<128x128xf32>,
    %c4_i32 = arith.constant 4 : i32
    return
  }
  func.func @transform_0(%arg0: i32) -> (i32, i32) {
    %c0_i32 = arith.constant 0 : i32
    %c0_i32_0 = arith.constant 0 : i32
    return %arg0, %c0_i32 : i32, i32
  }
  func.func @transform_1(%arg0: i32) -> (i32, i32) {
    %c0_i32 = arith.constant 0 : i32
    %c0_i32_0 = arith.constant 0 : i32
    %c0_i32_1 = arith.constant 0 : i32
    return %c0_i32, %c0_i32_0 : i32, i32
  }
  func.func @transform_2(%arg0: i32) -> (i32, i32) {
    %c0_i32 = arith.constant 0 : i32
    %c0_i32_0 = arith.constant 0 : i32
    return %arg0, %c0_i32 : i32, i32
  }
}

module attributes {stable_mosaic.version = 11 : i64} {
  func.func @_mm_stats_kernel(%arg0: i32, %arg1: memref<128x128xbf16, #tpu.memory_space<vmem>>, %arg2: memref<128x128xbf16, #tpu.memory_space<vmem>>, %arg3: memref<128x128xf32, #tpu.memory_space<vmem>>, %arg4: memref<1x128xf32, #tpu.memory_space<vmem>>, %arg5: memref<1x128xf32, #tpu.memory_space<vmem>>) attributes {dimension_semantics = [#tpu.dimension_semantics<arbitrary>], iteration_bounds = array<i64: 1>, scalar_prefetch = 0 : i64, scratch_operands = 0 : i64, tpu.core_type = #tpu.core_type<tc>, window_params = [{transform_indices = @transform_0, window_bounds = array<i64: 128, 128>}, {pipeline_mode = #tpu.pipeline_mode<synchronous>, transform_indices = @transform_1, window_bounds = array<i64: 128, 128>}, {transform_indices = @transform_2, window_bounds = array<i64: 128, 128>}, {pipeline_mode = #tpu.pipeline_mode<synchronous>, transform_indices = @transform_3, window_bounds = array<i64: 1, 128>}, {pipeline_mode = #tpu.pipeline_mode<synchronous>, transform_indices = @transform_4, window_bounds = array<i64: 1, 128>}]} {
    %c0_i32 = arith.constant 0 : i32
    %0 = arith.cmpi eq, %arg0, %c0_i32 : i32
    %1 = arith.extui %0 : i1 to i32
    %c0_i32_0 = arith.constant 0 : i32
    %2 = arith.cmpi ne, %1, %c0_i32_0 : i32
    scf.if %2 {
      %cst_15 = arith.constant 0.000000e+00 : f32
      %22 = vector.broadcast %cst_15 : f32 to vector<1x128xf32>
      %c0_16 = arith.constant 0 : index
      %c0_17 = arith.constant 0 : index
      %23 = vector.load %arg4[%c0_16, %c0_17] : memref<1x128xf32, #tpu.memory_space<vmem>>, vector<1x128xf32>
      tpu.vector_store %arg4[%c0_16, %c0_17], %22 {strides = array<i32>} : memref<1x128xf32, #tpu.memory_space<vmem>>, vector<1x128xf32>,
      %cst_18 = arith.constant 0.000000e+00 : f32
      %24 = vector.broadcast %cst_18 : f32 to vector<1x128xf32>
      %c0_19 = arith.constant 0 : index
      %c0_20 = arith.constant 0 : index
      %25 = vector.load %arg5[%c0_19, %c0_20] : memref<1x128xf32, #tpu.memory_space<vmem>>, vector<1x128xf32>
      tpu.vector_store %arg5[%c0_19, %c0_20], %24 {strides = array<i32>} : memref<1x128xf32, #tpu.memory_space<vmem>>, vector<1x128xf32>,
    } else {
    }
    %c0_i32_1 = arith.constant 0 : i32
    %c128_i32 = arith.constant 128 : i32
    %3 = arith.muli %c0_i32_1, %c128_i32 : i32
    %4 = tpu.assume_multiple %3, 128 : i32
    %5 = arith.index_cast %4 : i32 to index
    %c0 = arith.constant 0 : index
    %6 = vector.load %arg1[%5, %c0] : memref<128x128xbf16, #tpu.memory_space<vmem>>, vector<128x128xbf16>
    %c0_2 = arith.constant 0 : index
    %c0_3 = arith.constant 0 : index
    %7 = vector.load %arg2[%c0_2, %c0_3] : memref<128x128xbf16, #tpu.memory_space<vmem>>, vector<128x128xbf16>
    %cst = arith.constant dense<0.000000e+00> : vector<128x128xf32>
    %8 = tpu.matmul %6, %7, %cst {dimension_numbers = #tpu.dot_dimension_numbers<[1], [0], [0], [1], [0, 0, 1, 1], [], []>} : vector<128x128xbf16>, vector<128x128xbf16>, vector<128x128xf32> -> vector<128x128xf32>
    %9 = arith.index_cast %4 : i32 to index
    %c0_4 = arith.constant 0 : index
    %10 = vector.load %arg3[%9, %c0_4] : memref<128x128xf32, #tpu.memory_space<vmem>>, vector<128x128xf32>
    tpu.vector_store %arg3[%9, %c0_4], %8 {strides = array<i32>} : memref<128x128xf32, #tpu.memory_space<vmem>>, vector<128x128xf32>,
    %c0_5 = arith.constant 0 : index
    %c0_6 = arith.constant 0 : index
    %11 = vector.load %arg4[%c0_5, %c0_6] : memref<1x128xf32, #tpu.memory_space<vmem>>, vector<1x128xf32>
    %cst_7 = arith.constant dense<0.000000e+00> : vector<128xf32>
    %12 = vector.multi_reduction <add>, %8, %cst_7 [0] : vector<128x128xf32> to vector<128xf32>
    %13 = vector.shape_cast %12 : vector<128xf32> to vector<1x128xf32>
    %14 = arith.addf %11, %13 : vector<1x128xf32>
    %c0_8 = arith.constant 0 : index
    %c0_9 = arith.constant 0 : index
    %15 = vector.load %arg4[%c0_8, %c0_9] : memref<1x128xf32, #tpu.memory_space<vmem>>, vector<1x128xf32>
    tpu.vector_store %arg4[%c0_8, %c0_9], %14 {strides = array<i32>} : memref<1x128xf32, #tpu.memory_space<vmem>>, vector<1x128xf32>,
    %c0_10 = arith.constant 0 : index
    %c0_11 = arith.constant 0 : index
    %16 = vector.load %arg5[%c0_10, %c0_11] : memref<1x128xf32, #tpu.memory_space<vmem>>, vector<1x128xf32>
    %17 = arith.mulf %8, %8 : vector<128x128xf32>
    %cst_12 = arith.constant dense<0.000000e+00> : vector<128xf32>
    %18 = vector.multi_reduction <add>, %17, %cst_12 [0] : vector<128x128xf32> to vector<128xf32>
    %19 = vector.shape_cast %18 : vector<128xf32> to vector<1x128xf32>
    %20 = arith.addf %16, %19 : vector<1x128xf32>
    %c0_13 = arith.constant 0 : index
    %c0_14 = arith.constant 0 : index
    %21 = vector.load %arg5[%c0_13, %c0_14] : memref<1x128xf32, #tpu.memory_space<vmem>>, vector<1x128xf32>
    tpu.vector_store %arg5[%c0_13, %c0_14], %20 {strides = array<i32>} : memref<1x128xf32, #tpu.memory_space<vmem>>, vector<1x128xf32>,
    %c1_i32 = arith.constant 1 : i32
    return
  }
  func.func @transform_0(%arg0: i32) -> (i32, i32) {
    %c0_i32 = arith.constant 0 : i32
    %c0_i32_0 = arith.constant 0 : i32
    return %arg0, %c0_i32 : i32, i32
  }
  func.func @transform_1(%arg0: i32) -> (i32, i32) {
    %c0_i32 = arith.constant 0 : i32
    %c0_i32_0 = arith.constant 0 : i32
    %c0_i32_1 = arith.constant 0 : i32
    return %c0_i32, %c0_i32_0 : i32, i32
  }
  func.func @transform_2(%arg0: i32) -> (i32, i32) {
    %c0_i32 = arith.constant 0 : i32
    %c0_i32_0 = arith.constant 0 : i32
    return %arg0, %c0_i32 : i32, i32
  }
  func.func @transform_3(%arg0: i32) -> (i32, i32) {
    %c0_i32 = arith.constant 0 : i32
    %c0_i32_0 = arith.constant 0 : i32
    %c0_i32_1 = arith.constant 0 : i32
    return %c0_i32, %c0_i32_0 : i32, i32
  }
  func.func @transform_4(%arg0: i32) -> (i32, i32) {
    %c0_i32 = arith.constant 0 : i32
    %c0_i32_0 = arith.constant 0 : i32
    %c0_i32_1 = arith.constant 0 : i32
    return %c0_i32, %c0_i32_0 : i32, i32
  }
}

module attributes {stable_mosaic.version = 11 : i64} {
  func.func @_bn_act_kernel(%arg0: i32, %arg1: memref<128x128xf32, #tpu.memory_space<vmem>>, %arg2: memref<1x128xf32, #tpu.memory_space<vmem>>, %arg3: memref<1x128xf32, #tpu.memory_space<vmem>>, %arg4: memref<128x128xf32, #tpu.memory_space<vmem>>) attributes {dimension_semantics = [#tpu.dimension_semantics<parallel>], iteration_bounds = array<i64: 1>, scalar_prefetch = 0 : i64, scratch_operands = 0 : i64, tpu.core_type = #tpu.core_type<tc>, window_params = [{transform_indices = @transform_0, window_bounds = array<i64: 128, 128>}, {pipeline_mode = #tpu.pipeline_mode<synchronous>, transform_indices = @transform_1, window_bounds = array<i64: 1, 128>}, {pipeline_mode = #tpu.pipeline_mode<synchronous>, transform_indices = @transform_2, window_bounds = array<i64: 1, 128>}, {transform_indices = @transform_3, window_bounds = array<i64: 128, 128>}]} {
    %c0 = arith.constant 0 : index
    %c0_0 = arith.constant 0 : index
    %0 = vector.load %arg1[%c0, %c0_0] : memref<128x128xf32, #tpu.memory_space<vmem>>, vector<128x128xf32>
    %c0_1 = arith.constant 0 : index
    %c0_2 = arith.constant 0 : index
    %1 = vector.load %arg2[%c0_1, %c0_2] : memref<1x128xf32, #tpu.memory_space<vmem>>, vector<1x128xf32>
    %2 = vector.broadcast %1 : vector<1x128xf32> to vector<128x128xf32>
    %3 = arith.mulf %0, %2 : vector<128x128xf32>
    %c0_3 = arith.constant 0 : index
    %c0_4 = arith.constant 0 : index
    %4 = vector.load %arg3[%c0_3, %c0_4] : memref<1x128xf32, #tpu.memory_space<vmem>>, vector<1x128xf32>
    %5 = vector.broadcast %4 : vector<1x128xf32> to vector<128x128xf32>
    %6 = arith.addf %3, %5 : vector<128x128xf32>
    %cst = arith.constant 2.000000e-01 : f32
    %7 = vector.broadcast %cst : f32 to vector<128x128xf32>
    %8 = arith.mulf %7, %6 : vector<128x128xf32>
    %9 = arith.maximumf %6, %8 : vector<128x128xf32>
    %c0_5 = arith.constant 0 : index
    %c0_6 = arith.constant 0 : index
    %10 = vector.load %arg4[%c0_5, %c0_6] : memref<128x128xf32, #tpu.memory_space<vmem>>, vector<128x128xf32>
    tpu.vector_store %arg4[%c0_5, %c0_6], %9 {strides = array<i32>} : memref<128x128xf32, #tpu.memory_space<vmem>>, vector<128x128xf32>,
    return
  }
  func.func @transform_0(%arg0: i32) -> (i32, i32) {
    %c0_i32 = arith.constant 0 : i32
    %c0_i32_0 = arith.constant 0 : i32
    return %arg0, %c0_i32 : i32, i32
  }
  func.func @transform_1(%arg0: i32) -> (i32, i32) {
    %c0_i32 = arith.constant 0 : i32
    %c0_i32_0 = arith.constant 0 : i32
    %c0_i32_1 = arith.constant 0 : i32
    return %c0_i32, %c0_i32_0 : i32, i32
  }
  func.func @transform_2(%arg0: i32) -> (i32, i32) {
    %c0_i32 = arith.constant 0 : i32
    %c0_i32_0 = arith.constant 0 : i32
    %c0_i32_1 = arith.constant 0 : i32
    return %c0_i32, %c0_i32_0 : i32, i32
  }
  func.func @transform_3(%arg0: i32) -> (i32, i32) {
    %c0_i32 = arith.constant 0 : i32
    %c0_i32_0 = arith.constant 0 : i32
    return %arg0, %c0_i32 : i32, i32
  }
}

module attributes {stable_mosaic.version = 11 : i64} {
  func.func @_mm_stats_kernel(%arg0: i32, %arg1: memref<32x256xbf16, #tpu.memory_space<vmem>>, %arg2: memref<256x128xbf16, #tpu.memory_space<vmem>>, %arg3: memref<32x128xf32, #tpu.memory_space<vmem>>, %arg4: memref<1x128xf32, #tpu.memory_space<vmem>>, %arg5: memref<1x128xf32, #tpu.memory_space<vmem>>) attributes {dimension_semantics = [#tpu.dimension_semantics<arbitrary>], iteration_bounds = array<i64: 1>, scalar_prefetch = 0 : i64, scratch_operands = 0 : i64, tpu.core_type = #tpu.core_type<tc>, window_params = [{transform_indices = @transform_0, window_bounds = array<i64: 32, 256>}, {pipeline_mode = #tpu.pipeline_mode<synchronous>, transform_indices = @transform_1, window_bounds = array<i64: 256, 128>}, {transform_indices = @transform_2, window_bounds = array<i64: 32, 128>}, {pipeline_mode = #tpu.pipeline_mode<synchronous>, transform_indices = @transform_3, window_bounds = array<i64: 1, 128>}, {pipeline_mode = #tpu.pipeline_mode<synchronous>, transform_indices = @transform_4, window_bounds = array<i64: 1, 128>}]} {
    %c0_i32 = arith.constant 0 : i32
    %0 = arith.cmpi eq, %arg0, %c0_i32 : i32
    %1 = arith.extui %0 : i1 to i32
    %c0_i32_0 = arith.constant 0 : i32
    %2 = arith.cmpi ne, %1, %c0_i32_0 : i32
    scf.if %2 {
      %cst_15 = arith.constant 0.000000e+00 : f32
      %22 = vector.broadcast %cst_15 : f32 to vector<1x128xf32>
      %c0_16 = arith.constant 0 : index
      %c0_17 = arith.constant 0 : index
      %23 = vector.load %arg4[%c0_16, %c0_17] : memref<1x128xf32, #tpu.memory_space<vmem>>, vector<1x128xf32>
      tpu.vector_store %arg4[%c0_16, %c0_17], %22 {strides = array<i32>} : memref<1x128xf32, #tpu.memory_space<vmem>>, vector<1x128xf32>,
      %cst_18 = arith.constant 0.000000e+00 : f32
      %24 = vector.broadcast %cst_18 : f32 to vector<1x128xf32>
      %c0_19 = arith.constant 0 : index
      %c0_20 = arith.constant 0 : index
      %25 = vector.load %arg5[%c0_19, %c0_20] : memref<1x128xf32, #tpu.memory_space<vmem>>, vector<1x128xf32>
      tpu.vector_store %arg5[%c0_19, %c0_20], %24 {strides = array<i32>} : memref<1x128xf32, #tpu.memory_space<vmem>>, vector<1x128xf32>,
    } else {
    }
    %c0_i32_1 = arith.constant 0 : i32
    %c32_i32 = arith.constant 32 : i32
    %3 = arith.muli %c0_i32_1, %c32_i32 : i32
    %4 = tpu.assume_multiple %3, 32 : i32
    %5 = arith.index_cast %4 : i32 to index
    %c0 = arith.constant 0 : index
    %6 = vector.load %arg1[%5, %c0] : memref<32x256xbf16, #tpu.memory_space<vmem>>, vector<32x256xbf16>
    %c0_2 = arith.constant 0 : index
    %c0_3 = arith.constant 0 : index
    %7 = vector.load %arg2[%c0_2, %c0_3] : memref<256x128xbf16, #tpu.memory_space<vmem>>, vector<256x128xbf16>
    %cst = arith.constant dense<0.000000e+00> : vector<32x128xf32>
    %8 = tpu.matmul %6, %7, %cst {dimension_numbers = #tpu.dot_dimension_numbers<[1], [0], [0], [1], [0, 0, 1, 1], [], []>} : vector<32x256xbf16>, vector<256x128xbf16>, vector<32x128xf32> -> vector<32x128xf32>
    %9 = arith.index_cast %4 : i32 to index
    %c0_4 = arith.constant 0 : index
    %10 = vector.load %arg3[%9, %c0_4] : memref<32x128xf32, #tpu.memory_space<vmem>>, vector<32x128xf32>
    tpu.vector_store %arg3[%9, %c0_4], %8 {strides = array<i32>} : memref<32x128xf32, #tpu.memory_space<vmem>>, vector<32x128xf32>,
    %c0_5 = arith.constant 0 : index
    %c0_6 = arith.constant 0 : index
    %11 = vector.load %arg4[%c0_5, %c0_6] : memref<1x128xf32, #tpu.memory_space<vmem>>, vector<1x128xf32>
    %cst_7 = arith.constant dense<0.000000e+00> : vector<128xf32>
    %12 = vector.multi_reduction <add>, %8, %cst_7 [0] : vector<32x128xf32> to vector<128xf32>
    %13 = vector.shape_cast %12 : vector<128xf32> to vector<1x128xf32>
    %14 = arith.addf %11, %13 : vector<1x128xf32>
    %c0_8 = arith.constant 0 : index
    %c0_9 = arith.constant 0 : index
    %15 = vector.load %arg4[%c0_8, %c0_9] : memref<1x128xf32, #tpu.memory_space<vmem>>, vector<1x128xf32>
    tpu.vector_store %arg4[%c0_8, %c0_9], %14 {strides = array<i32>} : memref<1x128xf32, #tpu.memory_space<vmem>>, vector<1x128xf32>,
    %c0_10 = arith.constant 0 : index
    %c0_11 = arith.constant 0 : index
    %16 = vector.load %arg5[%c0_10, %c0_11] : memref<1x128xf32, #tpu.memory_space<vmem>>, vector<1x128xf32>
    %17 = arith.mulf %8, %8 : vector<32x128xf32>
    %cst_12 = arith.constant dense<0.000000e+00> : vector<128xf32>
    %18 = vector.multi_reduction <add>, %17, %cst_12 [0] : vector<32x128xf32> to vector<128xf32>
    %19 = vector.shape_cast %18 : vector<128xf32> to vector<1x128xf32>
    %20 = arith.addf %16, %19 : vector<1x128xf32>
    %c0_13 = arith.constant 0 : index
    %c0_14 = arith.constant 0 : index
    %21 = vector.load %arg5[%c0_13, %c0_14] : memref<1x128xf32, #tpu.memory_space<vmem>>, vector<1x128xf32>
    tpu.vector_store %arg5[%c0_13, %c0_14], %20 {strides = array<i32>} : memref<1x128xf32, #tpu.memory_space<vmem>>, vector<1x128xf32>,
    %c1_i32 = arith.constant 1 : i32
    return
  }
  func.func @transform_0(%arg0: i32) -> (i32, i32) {
    %c0_i32 = arith.constant 0 : i32
    %c0_i32_0 = arith.constant 0 : i32
    return %arg0, %c0_i32 : i32, i32
  }
  func.func @transform_1(%arg0: i32) -> (i32, i32) {
    %c0_i32 = arith.constant 0 : i32
    %c0_i32_0 = arith.constant 0 : i32
    %c0_i32_1 = arith.constant 0 : i32
    return %c0_i32, %c0_i32_0 : i32, i32
  }
  func.func @transform_2(%arg0: i32) -> (i32, i32) {
    %c0_i32 = arith.constant 0 : i32
    %c0_i32_0 = arith.constant 0 : i32
    return %arg0, %c0_i32 : i32, i32
  }
  func.func @transform_3(%arg0: i32) -> (i32, i32) {
    %c0_i32 = arith.constant 0 : i32
    %c0_i32_0 = arith.constant 0 : i32
    %c0_i32_1 = arith.constant 0 : i32
    return %c0_i32, %c0_i32_0 : i32, i32
  }
  func.func @transform_4(%arg0: i32) -> (i32, i32) {
    %c0_i32 = arith.constant 0 : i32
    %c0_i32_0 = arith.constant 0 : i32
    %c0_i32_1 = arith.constant 0 : i32
    return %c0_i32, %c0_i32_0 : i32, i32
  }
}

module attributes {stable_mosaic.version = 11 : i64} {
  func.func @_bn_act_kernel(%arg0: i32, %arg1: memref<32x128xf32, #tpu.memory_space<vmem>>, %arg2: memref<1x128xf32, #tpu.memory_space<vmem>>, %arg3: memref<1x128xf32, #tpu.memory_space<vmem>>, %arg4: memref<32x128xf32, #tpu.memory_space<vmem>>) attributes {dimension_semantics = [#tpu.dimension_semantics<parallel>], iteration_bounds = array<i64: 1>, scalar_prefetch = 0 : i64, scratch_operands = 0 : i64, tpu.core_type = #tpu.core_type<tc>, window_params = [{transform_indices = @transform_0, window_bounds = array<i64: 32, 128>}, {pipeline_mode = #tpu.pipeline_mode<synchronous>, transform_indices = @transform_1, window_bounds = array<i64: 1, 128>}, {pipeline_mode = #tpu.pipeline_mode<synchronous>, transform_indices = @transform_2, window_bounds = array<i64: 1, 128>}, {transform_indices = @transform_3, window_bounds = array<i64: 32, 128>}]} {
    %c0 = arith.constant 0 : index
    %c0_0 = arith.constant 0 : index
    %0 = vector.load %arg1[%c0, %c0_0] : memref<32x128xf32, #tpu.memory_space<vmem>>, vector<32x128xf32>
    %c0_1 = arith.constant 0 : index
    %c0_2 = arith.constant 0 : index
    %1 = vector.load %arg2[%c0_1, %c0_2] : memref<1x128xf32, #tpu.memory_space<vmem>>, vector<1x128xf32>
    %2 = vector.broadcast %1 : vector<1x128xf32> to vector<32x128xf32>
    %3 = arith.mulf %0, %2 : vector<32x128xf32>
    %c0_3 = arith.constant 0 : index
    %c0_4 = arith.constant 0 : index
    %4 = vector.load %arg3[%c0_3, %c0_4] : memref<1x128xf32, #tpu.memory_space<vmem>>, vector<1x128xf32>
    %5 = vector.broadcast %4 : vector<1x128xf32> to vector<32x128xf32>
    %6 = arith.addf %3, %5 : vector<32x128xf32>
    %cst = arith.constant 2.000000e-01 : f32
    %7 = vector.broadcast %cst : f32 to vector<32x128xf32>
    %8 = arith.mulf %7, %6 : vector<32x128xf32>
    %9 = arith.maximumf %6, %8 : vector<32x128xf32>
    %c0_5 = arith.constant 0 : index
    %c0_6 = arith.constant 0 : index
    %10 = vector.load %arg4[%c0_5, %c0_6] : memref<32x128xf32, #tpu.memory_space<vmem>>, vector<32x128xf32>
    tpu.vector_store %arg4[%c0_5, %c0_6], %9 {strides = array<i32>} : memref<32x128xf32, #tpu.memory_space<vmem>>, vector<32x128xf32>,
    return
  }
  func.func @transform_0(%arg0: i32) -> (i32, i32) {
    %c0_i32 = arith.constant 0 : i32
    %c0_i32_0 = arith.constant 0 : i32
    return %arg0, %c0_i32 : i32, i32
  }
  func.func @transform_1(%arg0: i32) -> (i32, i32) {
    %c0_i32 = arith.constant 0 : i32
    %c0_i32_0 = arith.constant 0 : i32
    %c0_i32_1 = arith.constant 0 : i32
    return %c0_i32, %c0_i32_0 : i32, i32
  }
  func.func @transform_2(%arg0: i32) -> (i32, i32) {
    %c0_i32 = arith.constant 0 : i32
    %c0_i32_0 = arith.constant 0 : i32
    %c0_i32_1 = arith.constant 0 : i32
    return %c0_i32, %c0_i32_0 : i32, i32
  }
  func.func @transform_3(%arg0: i32) -> (i32, i32) {
    %c0_i32 = arith.constant 0 : i32
    %c0_i32_0 = arith.constant 0 : i32
    return %arg0, %c0_i32 : i32, i32
  }
}

module attributes {stable_mosaic.version = 11 : i64} {
  func.func @_mm_act_kernel(%arg0: i32, %arg1: memref<16x512xbf16, #tpu.memory_space<vmem>>, %arg2: memref<512x128xbf16, #tpu.memory_space<vmem>>, %arg3: memref<16x128xf32, #tpu.memory_space<vmem>>) attributes {dimension_semantics = [#tpu.dimension_semantics<parallel>], iteration_bounds = array<i64: 1>, scalar_prefetch = 0 : i64, scratch_operands = 0 : i64, tpu.core_type = #tpu.core_type<tc>, window_params = [{transform_indices = @transform_0, window_bounds = array<i64: 16, 512>}, {pipeline_mode = #tpu.pipeline_mode<synchronous>, transform_indices = @transform_1, window_bounds = array<i64: 512, 128>}, {transform_indices = @transform_2, window_bounds = array<i64: 16, 128>}]} {
    %c0_i32 = arith.constant 0 : i32
    %c16_i32 = arith.constant 16 : i32
    %0 = arith.muli %c0_i32, %c16_i32 : i32
    %1 = tpu.assume_multiple %0, 16 : i32
    %2 = arith.index_cast %1 : i32 to index
    %c0 = arith.constant 0 : index
    %3 = vector.load %arg1[%2, %c0] : memref<16x512xbf16, #tpu.memory_space<vmem>>, vector<16x512xbf16>
    %c0_0 = arith.constant 0 : index
    %c0_1 = arith.constant 0 : index
    %4 = vector.load %arg2[%c0_0, %c0_1] : memref<512x128xbf16, #tpu.memory_space<vmem>>, vector<512x128xbf16>
    %cst = arith.constant dense<0.000000e+00> : vector<16x128xf32>
    %5 = tpu.matmul %3, %4, %cst {dimension_numbers = #tpu.dot_dimension_numbers<[1], [0], [0], [1], [0, 0, 1, 1], [], []>} : vector<16x512xbf16>, vector<512x128xbf16>, vector<16x128xf32> -> vector<16x128xf32>
    %6 = arith.index_cast %1 : i32 to index
    %c0_2 = arith.constant 0 : index
    %7 = vector.load %arg3[%6, %c0_2] : memref<16x128xf32, #tpu.memory_space<vmem>>, vector<16x128xf32>
    tpu.vector_store %arg3[%6, %c0_2], %5 {strides = array<i32>} : memref<16x128xf32, #tpu.memory_space<vmem>>, vector<16x128xf32>,
    %c1_i32 = arith.constant 1 : i32
    return
  }
  func.func @transform_0(%arg0: i32) -> (i32, i32) {
    %c0_i32 = arith.constant 0 : i32
    %c0_i32_0 = arith.constant 0 : i32
    return %arg0, %c0_i32 : i32, i32
  }
  func.func @transform_1(%arg0: i32) -> (i32, i32) {
    %c0_i32 = arith.constant 0 : i32
    %c0_i32_0 = arith.constant 0 : i32
    %c0_i32_1 = arith.constant 0 : i32
    return %c0_i32, %c0_i32_0 : i32, i32
  }
  func.func @transform_2(%arg0: i32) -> (i32, i32) {
    %c0_i32 = arith.constant 0 : i32
    %c0_i32_0 = arith.constant 0 : i32
    return %arg0, %c0_i32 : i32, i32
  }
}

</mosaic_0001>

<bundles_post_ra>
// kernel: discriminator_forward.7
= control target key start
LH: loop header
LB: loop body
LE: loop exit
PB: predicated region body
PF: predicated region fallthrough
CT: control target
= control target key end

     0   :  { %v435_v16 = vmov 0.0   ;;  %s575_s1 = inlined_call_operand.vmem [shape: bf16[128,128], index: 1, kind: input, shape index: {}]   ;;  %s576_s0 = inlined_call_operand.vmem [shape: bf16[128,128], index: 0, kind: input, shape index: {}]   ;;  %s577_s3 = inlined_call_operand.vmem [shape: f32[1,128], index: 3, kind: output, shape index: {1}]   ;;  %s578_s4 = inlined_call_operand.vmem [shape: f32[1,128], index: 4, kind: output, shape index: {2}]   ;;  %s579_s2 = inlined_call_operand.vmem [shape: f32[128,128], index: 2, kind: output, shape index: {0}]  }
   0x1   :  { %v419_v0 = vld [vmem:[%s575_s1] sm:$0xff]   ;;  %v420_v1 = vld [vmem:[%s575_s1 + $0x8] sm:$0xff]   ;;  %v421_v2 = vld [vmem:[%s575_s1 + $0x10] sm:$0xff]   ;;  %19 = vst [vmem:[%s577_s3] sm:$0x1] %v435_v16 }
   0x2   :  { %370 = vmatprep.subr.bf16.mxu0 %v419_v0  ;;  %402 = vmatprep.subr.bf16.mxu1 %v419_v0  ;;  %v422_v3 = vld [vmem:[%s575_s1 + $0x18] sm:$0xff]   ;;  %v427_v4 = vld [vmem:[%s576_s0] sm:$0xff]   ;;  %v424_v7 = vld [vmem:[%s575_s1 + $0x28] sm:$0xff]   ;;  %20 = vst [vmem:[%s578_s4] sm:$0x1] %v435_v16 }
   0x3   :  { %371 = vmatpush3.bf16.msra.mxu0 %v419_v0  ;;  %410 = vmatpush3.bf16.msra.mxu1 %v419_v0  ;;  %v423_v5 = vld [vmem:[%s575_s1 + $0x20] sm:$0xff]   ;;  %v425_v8 = vld [vmem:[%s575_s1 + $0x30] sm:$0xff]   ;;  %v426_v9 = vld [vmem:[%s575_s1 + $0x38] sm:$0xff]  }
   0x4   :  { %372 = vmatprep.subr.bf16.mxu0 %v420_v1  ;;  %403 = vmatprep.subr.bf16.mxu1 %v420_v1  ;;  %v431_v6 = vld [vmem:[%s576_s0 + $0x20] sm:$0xff]   ;;  %v428_v10 = vld [vmem:[%s576_s0 + $0x8] sm:$0xff]   ;;  %v429_v12 = vld [vmem:[%s576_s0 + $0x10] sm:$0xff]  }
   0x5   :  { %386 = vmatprep.mubr.bf16.mxu0 %v427_v4  ;;  %394 = vmatprep.mubr.bf16.mxu1 %v431_v6  ;;  %v432_v11 = vld [vmem:[%s576_s0 + $0x28] sm:$0xff]   ;;  %v433_v13 = vld [vmem:[%s576_s0 + $0x30] sm:$0xff]   ;;  %v430_v14 = vld [vmem:[%s576_s0 + $0x18] sm:$0xff]  }
   0x6   :  { %v434_v15 = vld [vmem:[%s576_s0 + $0x38] sm:$0xff]  }
   0x7   :  { %373 = vmatpush3.bf16.msra.mxu0 %v420_v1  ;;  %411 = vmatpush3.bf16.msra.mxu1 %v420_v1 }
   0x8   :  { %374 = vmatprep.subr.bf16.mxu0 %v421_v2  ;;  %404 = vmatprep.subr.bf16.mxu1 %v421_v2 }
   0xb   :  { %375 = vmatpush3.bf16.msra.mxu0 %v421_v2  ;;  %412 = vmatpush3.bf16.msra.mxu1 %v421_v2 }
   0xc   :  { %376 = vmatprep.subr.bf16.mxu0 %v422_v3  ;;  %405 = vmatprep.subr.bf16.mxu1 %v422_v3 }
   0xf   :  { %377 = vmatpush3.bf16.msra.mxu0 %v422_v3  ;;  %413 = vmatpush3.bf16.msra.mxu1 %v422_v3 }
  0x10   :  { %378 = vmatprep.subr.bf16.mxu0 %v423_v5  ;;  %406 = vmatprep.subr.bf16.mxu1 %v423_v5 }
  0x13   :  { %379 = vmatpush3.bf16.msra.mxu0 %v423_v5  ;;  %414 = vmatpush3.bf16.msra.mxu1 %v423_v5 }
  0x14   :  { %380 = vmatprep.subr.bf16.mxu0 %v424_v7  ;;  %407 = vmatprep.subr.bf16.mxu1 %v424_v7 }
  0x17   :  { %381 = vmatpush3.bf16.msra.mxu0 %v424_v7  ;;  %415 = vmatpush3.bf16.msra.mxu1 %v424_v7 }
  0x18   :  { %382 = vmatprep.subr.bf16.mxu0 %v425_v8  ;;  %408 = vmatprep.subr.bf16.mxu1 %v425_v8 }
  0x1b   :  { %383 = vmatpush3.bf16.msra.mxu0 %v425_v8  ;;  %416 = vmatpush3.bf16.msra.mxu1 %v425_v8 }
  0x1c   :  { %384 = vmatprep.subr.bf16.mxu0 %v426_v9  ;;  %409 = vmatprep.subr.bf16.mxu1 %v426_v9 }
  0x1f   :  { %385 = vmatpush3.bf16.msra.mxu0 %v426_v9  ;;  %417 = vmatpush3.bf16.msra.mxu1 %v426_v9 }
  0x22   :  { %387 = vmatmul.mubr.bf16.vlgmr.msra.gmra.mrb[0].mxu0 %v428_v10  ;;  %395 = vmatmul.mubr.bf16.vlgmr.msra.gmra.mrb[0].mxu1 %v432_v11 }
  0x23   :  { %390 = vmatprep.mubr.bf16.mxu0 %v429_v12  ;;  %398 = vmatprep.mubr.bf16.mxu1 %v433_v13 }
  0x2a   :  { %391 = vmatmul.mubr.bf16.gmra.mrb[4].mxu0 %v430_v14  ;;  %399 = vmatmul.mubr.bf16.gmra.mrb[4].mxu1 %v434_v15 }
  0xf5   :  { %v388_v17 = vpop.f32.mrb[0].mxu0  ;;  %v396_v18 = vpop.f32.mrb[0].mxu1 }
  0xf6   :  { %248 = vst [vmem:[%s579_s2 + $0x10] sm:$0xff] %v388_v17  ;;  %v183_v19 = vpop.f32.mrb[1].mxu0  ;;  %256 = vst [vmem:[%s579_s2 + $0x50] sm:$0xff] %v396_v18  ;;  %v215_v20 = vpop.f32.mrb[1].mxu1  ;;  %v289_v28 = vmul.f32 %v388_v17, %v388_v17  ;;  %v297_v60 = vmul.f32 %v396_v18, %v396_v18 }
  0xf7   :  { %246 = vst [vmem:[%s579_s2] sm:$0xff] %v183_v19  ;;  %v389_v21 = vpop.f32.mrb[2].mxu0  ;;  %254 = vst [vmem:[%s579_s2 + $0x40] sm:$0xff] %v215_v20  ;;  %v397_v22 = vpop.f32.mrb[2].mxu1  ;;  %v287_v25 = vmul.f32 %v183_v19, %v183_v19  ;;  %v295_v54 = vmul.f32 %v215_v20, %v215_v20 }
  0xf8   :  { %249 = vst [vmem:[%s579_s2 + $0x18] sm:$0xff] %v389_v21  ;;  %v186_v23 = vpop.f32.mrb[3].mxu0  ;;  %257 = vst [vmem:[%s579_s2 + $0x58] sm:$0xff] %v397_v22  ;;  %v218_v24 = vpop.f32.mrb[3].mxu1  ;;  %v290_v31 = vmul.f32 %v389_v21, %v389_v21  ;;  %v298_v63 = vmul.f32 %v397_v22, %v397_v22 }
  0xf9   :  { %247 = vst [vmem:[%s579_s2 + $0x8] sm:$0xff] %v186_v23  ;;  %v263_v26 = vadd.f32 %v186_v23, %v183_v19  ;;  %v288_v27 = vmul.f32 %v186_v23, %v186_v23  ;;  %255 = vst [vmem:[%s579_s2 + $0x48] sm:$0xff] %v218_v24  ;;  %v296_v59 = vmul.f32 %v218_v24, %v218_v24 }
  0xfb   :  { %v264_v29 = vadd.f32 %v388_v17, %v263_v26  ;;  %v303_v30 = vadd.f32 %v288_v27, %v287_v25  ;;  %v286_v27 = vld [vmem:[%s578_s4] sm:$0x1] }
  0xfd   :  { %v304_v32 = vadd.f32 %v303_v30, %v289_v28  ;;  %v392_v33 = vpop.f32.mrb[4].mxu0  ;;  %v265_v34 = vadd.f32 %v389_v21, %v264_v29  ;;  %v400_v35 = vpop.f32.mrb[4].mxu1 }
  0xfe   :  { %252 = vst [vmem:[%s579_s2 + $0x30] sm:$0xff] %v392_v33  ;;  %v199_v36 = vpop.f32.mrb[5].mxu0  ;;  %260 = vst [vmem:[%s579_s2 + $0x70] sm:$0xff] %v400_v35  ;;  %v231_v37 = vpop.f32.mrb[5].mxu1  ;;  %v293_v48 = vmul.f32 %v392_v33, %v392_v33  ;;  %v301_v8 = vmul.f32 %v400_v35, %v400_v35 }
  0xff   :  { %250 = vst [vmem:[%s579_s2 + $0x20] sm:$0xff] %v199_v36  ;;  %v266_v38 = vadd.f32 %v265_v34, %v199_v36  ;;  %v291_v39 = vmul.f32 %v199_v36, %v199_v36  ;;  %v305_v40 = vadd.f32 %v304_v32, %v290_v31  ;;  %v393_v41 = vpop.f32.mrb[6].mxu0  ;;  %258 = vst [vmem:[%s579_s2 + $0x60] sm:$0xff] %v231_v37  ;;  %v401_v42 = vpop.f32.mrb[6].mxu1 }
 0x100   :  { %253 = vst [vmem:[%s579_s2 + $0x38] sm:$0xff] %v393_v41  ;;  %v202_v43 = vpop.f32.mrb[7].mxu0  ;;  %261 = vst [vmem:[%s579_s2 + $0x78] sm:$0xff] %v401_v42  ;;  %v234_v44 = vpop.f32.mrb[7].mxu1  ;;  %v294_v51 = vmul.f32 %v393_v41, %v393_v41  ;;  %v299_v2 = vmul.f32 %v231_v37, %v231_v37  ;;  %v302_v11 = vmul.f32 %v401_v42, %v401_v42 }
 0x101   :  { %v306_v45 = vadd.f32 %v305_v40, %v291_v39  ;;  %251 = vst [vmem:[%s579_s2 + $0x28] sm:$0xff] %v202_v43  ;;  %v267_v46 = vadd.f32 %v266_v38, %v202_v43  ;;  %v292_v47 = vmul.f32 %v202_v43, %v202_v43  ;;  %259 = vst [vmem:[%s579_s2 + $0x68] sm:$0xff] %v234_v44 }
 0x102   :  { %v300_v7 = vmul.f32 %v234_v44, %v234_v44 }
 0x103   :  { %v268_v49 = vadd.f32 %v392_v33, %v267_v46  ;;  %v307_v50 = vadd.f32 %v306_v45, %v292_v47 }
 0x105   :  { %v308_v52 = vadd.f32 %v307_v50, %v293_v48  ;;  %v269_v53 = vadd.f32 %v393_v41, %v268_v49 }
 0x107   :  { %v270_v55 = vadd.f32 %v269_v53, %v215_v20  ;;  %v309_v56 = vadd.f32 %v308_v52, %v294_v51 }
 0x109   :  { %v310_v57 = vadd.f32 %v309_v56, %v295_v54  ;;  %v271_v58 = vadd.f32 %v270_v55, %v218_v24  ;;  %v262_v24 = vld [vmem:[%s577_s3] sm:$0x1] }
 0x10b   :  { %v272_v61 = vadd.f32 %v396_v18, %v271_v58  ;;  %v311_v62 = vadd.f32 %v310_v57, %v296_v59 }
 0x10d   :  { %v312_v0 = vadd.f32 %v311_v62, %v297_v60  ;;  %v273_v1 = vadd.f32 %v397_v22, %v272_v61 }
 0x10f   :  { %v274_v3 = vadd.f32 %v273_v1, %v231_v37  ;;  %v313_v4 = vadd.f32 %v312_v0, %v298_v63 }
 0x111   :  { %v314_v5 = vadd.f32 %v313_v4, %v299_v2  ;;  %v275_v6 = vadd.f32 %v274_v3, %v234_v44 }
 0x113   :  { %v276_v9 = vadd.f32 %v400_v35, %v275_v6  ;;  %v315_v10 = vadd.f32 %v314_v5, %v300_v7 }
 0x115   :  { %v277_v12 = vadd.f32 %v401_v42, %v276_v9  ;;  %v316_v13 = vadd.f32 %v315_v10, %v301_v8 }
 0x117   :  { %v278_v14 = vrot.slane %v277_v12, 4  ;;  %v317_v15 = vadd.f32 %v316_v13, %v302_v11 }
 0x119   :  { %v279_v16 = vadd.f32 %v278_v14, %v277_v12  ;;  %v318_v17 = vrot.slane %v317_v15, 4 }
 0x11b   :  { %v280_v18 = vrot.slane %v279_v16, 2  ;;  %v319_v19 = vadd.f32 %v318_v17, %v317_v15 }
 0x11d   :  { %v281_v20 = vadd.f32 %v280_v18, %v279_v16  ;;  %v320_v21 = vrot.slane %v319_v19, 2 }
 0x11f   :  { %v282_v22 = vrot.slane %v281_v20, 1  ;;  %v321_v23 = vadd.f32 %v320_v21, %v319_v19 }
 0x121   :  { %v283_v25 = vadd.f32 %v282_v22, %v281_v20  ;;  %v322_v26 = vrot.slane %v321_v23, 1 }
 0x123   :  { %v284_v28 = vadd.f32 %v283_v25, %v262_v24  ;;  %v323_v29 = vadd.f32 %v322_v26, %v321_v23 }
 0x125   :  { %285 = vst [vmem:[%s577_s3] sm:$0x1] %v284_v28  ;;  %v324_v30 = vadd.f32 %v323_v29, %v286_v27 }
 0x127   :  { %325 = vst [vmem:[%s578_s4] sm:$0x1] %v324_v30 }

// kernel: discriminator_forward.6
= control target key start
LH: loop header
LB: loop body
LE: loop exit
PB: predicated region body
PF: predicated region fallthrough
CT: control target
= control target key end

     0   :  { %s1929_s1 = inlined_call_operand.vmem [shape: bf16[128,128], index: 1, kind: input, shape index: {}]   ;;  %s1930_s0 = inlined_call_operand.vmem [shape: bf16[512,128], index: 0, kind: input, shape index: {}]   ;;  %s1931_s2 = inlined_call_operand.vmem [shape: f32[512,128], index: 2, kind: output, shape index: {}]  }
   0x1   :  { %v1466_v0 = vld [vmem:[%s1929_s1] sm:$0xff]   ;;  %v1468_v2 = vld [vmem:[%s1929_s1 + $0x8] sm:$0xff]   ;;  %v1470_v4 = vld [vmem:[%s1929_s1 + $0x10] sm:$0xff]  }
   0x2   :  { %v1467_v1 = vld [vmem:[%s1929_s1] sm:$0xff]   ;;  %1338 = vmatprep.subr.bf16.mxu0 %v1466_v0  ;;  %v1469_v3 = vld [vmem:[%s1929_s1 + $0x8] sm:$0xff]   ;;  %v1471_v5 = vld [vmem:[%s1929_s1 + $0x10] sm:$0xff]  }
   0x3   :  { %1370 = vmatprep.subr.bf16.mxu1 %v1467_v1  ;;  %1339 = vmatpush3.bf16.msra.mxu0 %v1466_v0  ;;  %v1472_v6 = vld [vmem:[%s1929_s1 + $0x18] sm:$0xff]   ;;  %v1474_v8 = vld [vmem:[%s1929_s1 + $0x20] sm:$0xff]   ;;  %v1476_v10 = vld [vmem:[%s1929_s1 + $0x28] sm:$0xff]  }
   0x4   :  { %1371 = vmatpush3.bf16.msra.mxu1 %v1467_v1  ;;  %1340 = vmatprep.subr.bf16.mxu0 %v1468_v2  ;;  %v1473_v7 = vld [vmem:[%s1929_s1 + $0x18] sm:$0xff]   ;;  %v1475_v9 = vld [vmem:[%s1929_s1 + $0x20] sm:$0xff]   ;;  %v1477_v11 = vld [vmem:[%s1929_s1 + $0x28] sm:$0xff]  }
   0x5   :  { %1372 = vmatprep.subr.bf16.mxu1 %v1469_v3  ;;  %v1482_v12 = vld [vmem:[%s1930_s0] sm:$0xff]   ;;  %v1478_v14 = vld [vmem:[%s1929_s1 + $0x30] sm:$0xff]   ;;  %v1480_v16 = vld [vmem:[%s1929_s1 + $0x38] sm:$0xff]  }
   0x6   :  { %v1483_v13 = vld [vmem:[%s1930_s0 + $0x40] sm:$0xff]   ;;  %1354 = vmatprep.mubr.bf16.mxu0 %v1482_v12  ;;  %v1479_v15 = vld [vmem:[%s1929_s1 + $0x30] sm:$0xff]   ;;  %v1481_v17 = vld [vmem:[%s1929_s1 + $0x38] sm:$0xff]  }
   0x7   :  { %1341 = vmatpush3.bf16.msra.mxu0 %v1468_v2  ;;  %1386 = vmatprep.mubr.bf16.mxu1 %v1483_v13  ;;  %v1484_v18 = vld [vmem:[%s1930_s0 + $0x8] sm:$0xff]   ;;  %v1486_v19 = vld [vmem:[%s1929_s1] sm:$0xff]   ;;  %v1490_v24 = vld [vmem:[%s1930_s0 + $0x10] sm:$0xff]  }
   0x8   :  { %1373 = vmatpush3.bf16.msra.mxu1 %v1469_v3  ;;  %1342 = vmatprep.subr.bf16.mxu0 %v1470_v4  ;;  %v1487_v20 = vld [vmem:[%s1929_s1] sm:$0xff]   ;;  %v1485_v21 = vld [vmem:[%s1930_s0 + $0x48] sm:$0xff]   ;;  %v1491_v25 = vld [vmem:[%s1930_s0 + $0x50] sm:$0xff]  }
   0x9   :  { %1374 = vmatprep.subr.bf16.mxu1 %v1471_v5  ;;  %v1488_v22 = vld [vmem:[%s1929_s1 + $0x8] sm:$0xff]   ;;  %v1492_v26 = vld [vmem:[%s1930_s0 + $0x18] sm:$0xff]   ;;  %v1494_v27 = vld [vmem:[%s1929_s1 + $0x10] sm:$0xff]  }
   0xa   :  { %v1489_v23 = vld [vmem:[%s1929_s1 + $0x8] sm:$0xff]   ;;  %v1495_v28 = vld [vmem:[%s1929_s1 + $0x10] sm:$0xff]   ;;  %v1493_v29 = vld [vmem:[%s1930_s0 + $0x58] sm:$0xff]  }
   0xb   :  { %1343 = vmatpush3.bf16.msra.mxu0 %v1470_v4  ;;  %v1496_v30 = vld [vmem:[%s1929_s1 + $0x18] sm:$0xff]   ;;  %v1498_v32 = vld [vmem:[%s1930_s0 + $0x20] sm:$0xff]   ;;  %v1500_v34 = vld [vmem:[%s1930_s0 + $0x28] sm:$0xff]  }
   0xc   :  { %1375 = vmatpush3.bf16.msra.mxu1 %v1471_v5  ;;  %1344 = vmatprep.subr.bf16.mxu0 %v1472_v6  ;;  %v1497_v31 = vld [vmem:[%s1929_s1 + $0x18] sm:$0xff]   ;;  %v1499_v33 = vld [vmem:[%s1930_s0 + $0x60] sm:$0xff]   ;;  %v1501_v37 = vld [vmem:[%s1930_s0 + $0x68] sm:$0xff]  }
   0xd   :  { %1376 = vmatprep.subr.bf16.mxu1 %v1473_v7  ;;  %v1502_v35 = vld [vmem:[%s1929_s1 + $0x20] sm:$0xff]   ;;  %v1504_v38 = vld [vmem:[%s1929_s1 + $0x28] sm:$0xff]   ;;  %v1506_v40 = vld [vmem:[%s1930_s0 + $0x30] sm:$0xff]  }
   0xe   :  { %v1503_v36 = vld [vmem:[%s1929_s1 + $0x20] sm:$0xff]   ;;  %v1505_v39 = vld [vmem:[%s1929_s1 + $0x28] sm:$0xff]   ;;  %v1507_v41 = vld [vmem:[%s1930_s0 + $0x70] sm:$0xff]  }
   0xf   :  { %1345 = vmatpush3.bf16.msra.mxu0 %v1472_v6  ;;  %v1508_v42 = vld [vmem:[%s1930_s0 + $0x38] sm:$0xff]   ;;  %v1510_v43 = vld [vmem:[%s1929_s1 + $0x30] sm:$0xff]   ;;  %v1514_v48 = vld [vmem:[%s1930_s0 + $0x80] sm:$0xff]  }
  0x10   :  { %1377 = vmatpush3.bf16.msra.mxu1 %v1473_v7  ;;  %1346 = vmatprep.subr.bf16.mxu0 %v1474_v8  ;;  %v1511_v44 = vld [vmem:[%s1929_s1 + $0x30] sm:$0xff]   ;;  %v1509_v45 = vld [vmem:[%s1930_s0 + $0x78] sm:$0xff]   ;;  %v1515_v49 = vld [vmem:[%s1930_s0 + $0xc0] sm:$0xff]  }
  0x11   :  { %1378 = vmatprep.subr.bf16.mxu1 %v1475_v9  ;;  %v1512_v46 = vld [vmem:[%s1929_s1 + $0x38] sm:$0xff]   ;;  %v1516_v50 = vld [vmem:[%s1930_s0 + $0x88] sm:$0xff]   ;;  %v1518_v52 = vld [vmem:[%s1930_s0 + $0x90] sm:$0xff]  }
  0x12   :  { %v1513_v47 = vld [vmem:[%s1929_s1 + $0x38] sm:$0xff]   ;;  %v1517_v51 = vld [vmem:[%s1930_s0 + $0xc8] sm:$0xff]   ;;  %v1519_v53 = vld [vmem:[%s1930_s0 + $0xd0] sm:$0xff]  }
  0x13   :  { %1347 = vmatpush3.bf16.msra.mxu0 %v1474_v8  ;;  %v1520_v54 = vld [vmem:[%s1930_s0 + $0x98] sm:$0xff]   ;;  %v1522_v56 = vld [vmem:[%s1930_s0 + $0xa0] sm:$0xff]   ;;  %v1524_v58 = vld [vmem:[%s1930_s0 + $0xa8] sm:$0xff]  }
  0x14   :  { %1379 = vmatpush3.bf16.msra.mxu1 %v1475_v9  ;;  %1348 = vmatprep.subr.bf16.mxu0 %v1476_v10  ;;  %v1521_v55 = vld [vmem:[%s1930_s0 + $0xd8] sm:$0xff]   ;;  %v1523_v57 = vld [vmem:[%s1930_s0 + $0xe0] sm:$0xff]   ;;  %v1525_v59 = vld [vmem:[%s1930_s0 + $0xe8] sm:$0xff]  }
  0x15   :  { %1380 = vmatprep.subr.bf16.mxu1 %v1477_v11  ;;  %v1526_v60 = vld [vmem:[%s1930_s0 + $0xb0] sm:$0xff]   ;;  %v1528_v62 = vld [vmem:[%s1930_s0 + $0xb8] sm:$0xff]  }
  0x16   :  { %v1527_v61 = vld [vmem:[%s1930_s0 + $0xf0] sm:$0xff]   ;;  %v1529_v63 = vld [vmem:[%s1930_s0 + $0xf8] sm:$0xff]  }
  0x17   :  { %1349 = vmatpush3.bf16.msra.mxu0 %v1476_v10 }
  0x18   :  { %1381 = vmatpush3.bf16.msra.mxu1 %v1477_v11  ;;  %1350 = vmatprep.subr.bf16.mxu0 %v1478_v14 }
  0x19   :  { %1382 = vmatprep.subr.bf16.mxu1 %v1479_v15 }
  0x1b   :  { %1351 = vmatpush3.bf16.msra.mxu0 %v1478_v14 }
  0x1c   :  { %1383 = vmatpush3.bf16.msra.mxu1 %v1479_v15  ;;  %1352 = vmatprep.subr.bf16.mxu0 %v1480_v16 }
  0x1d   :  { %1384 = vmatprep.subr.bf16.mxu1 %v1481_v17 }
  0x1f   :  { %1353 = vmatpush3.bf16.msra.mxu0 %v1480_v16 }
  0x20   :  { %1385 = vmatpush3.bf16.msra.mxu1 %v1481_v17  ;;  %1402 = vmatprep.subr.bf16.mxu0 %v1486_v19 }
  0x21   :  { %1434 = vmatprep.subr.bf16.mxu1 %v1487_v20 }
  0x22   :  { %1355 = vmatmul.mubr.bf16.vlgmr.msra.gmra.mrb[0].mxu0 %v1484_v18 }
  0x23   :  { %1387 = vmatmul.mubr.bf16.vlgmr.msra.gmra.mrb[0].mxu1 %v1485_v21  ;;  %1403 = vmatpush3.bf16.msra.mxu0 %v1486_v19 }
  0x24   :  { %1435 = vmatpush3.bf16.msra.mxu1 %v1487_v20  ;;  %1404 = vmatprep.subr.bf16.mxu0 %v1488_v22 }
  0x25   :  { %1436 = vmatprep.subr.bf16.mxu1 %v1489_v23  ;;  %1358 = vmatprep.mubr.bf16.mxu0 %v1490_v24 }
  0x26   :  { %1390 = vmatprep.mubr.bf16.mxu1 %v1491_v25 }
  0x27   :  { %1405 = vmatpush3.bf16.msra.mxu0 %v1488_v22 }
  0x28   :  { %1437 = vmatpush3.bf16.msra.mxu1 %v1489_v23  ;;  %1406 = vmatprep.subr.bf16.mxu0 %v1494_v27 }
  0x29   :  { %1438 = vmatprep.subr.bf16.mxu1 %v1495_v28 }
  0x2a   :  { %1359 = vmatmul.mubr.bf16.gmra.mrb[4].mxu0 %v1492_v26 }
  0x2b   :  { %1391 = vmatmul.mubr.bf16.gmra.mrb[4].mxu1 %v1493_v29  ;;  %1407 = vmatpush3.bf16.msra.mxu0 %v1494_v27 }
  0x2c   :  { %1439 = vmatpush3.bf16.msra.mxu1 %v1495_v28  ;;  %1408 = vmatprep.subr.bf16.mxu0 %v1496_v30 }
  0x2d   :  { %1440 = vmatprep.subr.bf16.mxu1 %v1497_v31  ;;  %1362 = vmatprep.mubr.bf16.mxu0 %v1498_v32 }
  0x2e   :  { %1394 = vmatprep.mubr.bf16.mxu1 %v1499_v33 }
  0x2f   :  { %1409 = vmatpush3.bf16.msra.mxu0 %v1496_v30 }
  0x30   :  { %1441 = vmatpush3.bf16.msra.mxu1 %v1497_v31  ;;  %1410 = vmatprep.subr.bf16.mxu0 %v1502_v35 }
  0x31   :  { %1442 = vmatprep.subr.bf16.mxu1 %v1503_v36 }
  0x32   :  { %1363 = vmatmul.mubr.bf16.gmra.mrb[8].mxu0 %v1500_v34 }
  0x33   :  { %1395 = vmatmul.mubr.bf16.gmra.mrb[8].mxu1 %v1501_v37  ;;  %1411 = vmatpush3.bf16.msra.mxu0 %v1502_v35 }
  0x34   :  { %1443 = vmatpush3.bf16.msra.mxu1 %v1503_v36  ;;  %1412 = vmatprep.subr.bf16.mxu0 %v1504_v38 }
  0x35   :  { %1444 = vmatprep.subr.bf16.mxu1 %v1505_v39  ;;  %1366 = vmatprep.mubr.bf16.mxu0 %v1506_v40 }
  0x36   :  { %1398 = vmatprep.mubr.bf16.mxu1 %v1507_v41 }
  0x37   :  { %1413 = vmatpush3.bf16.msra.mxu0 %v1504_v38 }
  0x38   :  { %1445 = vmatpush3.bf16.msra.mxu1 %v1505_v39  ;;  %1414 = vmatprep.subr.bf16.mxu0 %v1510_v43 }
  0x39   :  { %1446 = vmatprep.subr.bf16.mxu1 %v1511_v44 }
  0x3a   :  { %1367 = vmatmul.mubr.bf16.gmra.mrb[12].mxu0 %v1508_v42 }
  0x3b   :  { %1399 = vmatmul.mubr.bf16.gmra.mrb[12].mxu1 %v1509_v45  ;;  %1415 = vmatpush3.bf16.msra.mxu0 %v1510_v43 }
  0x3c   :  { %1447 = vmatpush3.bf16.msra.mxu1 %v1511_v44  ;;  %1416 = vmatprep.subr.bf16.mxu0 %v1512_v46 }
  0x3d   :  { %1448 = vmatprep.subr.bf16.mxu1 %v1513_v47  ;;  %1418 = vmatprep.mubr.bf16.mxu0 %v1514_v48 }
  0x3e   :  { %1450 = vmatprep.mubr.bf16.mxu1 %v1515_v49 }
  0x3f   :  { %1417 = vmatpush3.bf16.msra.mxu0 %v1512_v46 }
  0x40   :  { %1449 = vmatpush3.bf16.msra.mxu1 %v1513_v47 }
  0x42   :  { %1419 = vmatmul.mubr.bf16.vlgmr.msra.gmra.mrb[16].mxu0 %v1516_v50 }
  0x43   :  { %1451 = vmatmul.mubr.bf16.vlgmr.msra.gmra.mrb[16].mxu1 %v1517_v51  ;;  %1422 = vmatprep.mubr.bf16.mxu0 %v1518_v52 }
  0x44   :  { %1454 = vmatprep.mubr.bf16.mxu1 %v1519_v53 }
  0x4a   :  { %1423 = vmatmul.mubr.bf16.gmra.mrb[20].mxu0 %v1520_v54 }
  0x4b   :  { %1455 = vmatmul.mubr.bf16.gmra.mrb[20].mxu1 %v1521_v55  ;;  %1426 = vmatprep.mubr.bf16.mxu0 %v1522_v56 }
  0x4c   :  { %1458 = vmatprep.mubr.bf16.mxu1 %v1523_v57 }
  0x52   :  { %1427 = vmatmul.mubr.bf16.gmra.mrb[24].mxu0 %v1524_v58 }
  0x53   :  { %1459 = vmatmul.mubr.bf16.gmra.mrb[24].mxu1 %v1525_v59  ;;  %1430 = vmatprep.mubr.bf16.mxu0 %v1526_v60 }
  0x54   :  { %1462 = vmatprep.mubr.bf16.mxu1 %v1527_v61 }
  0x5a   :  { %1431 = vmatmul.mubr.bf16.gmra.mrb[28].mxu0 %v1528_v62 }
  0x5b   :  { %1463 = vmatmul.mubr.bf16.gmra.mrb[28].mxu1 %v1529_v63 }
  0xf5   :  { %v1356_v0 = vpop.f32.mrb[0].mxu0 }
  0xf6   :  { %v239_v1 = vmul.f32 0.2, %v1356_v0  ;;  %v1388_v2 = vpop.f32.mrb[0].mxu1  ;;  %v174_v3 = vpop.f32.mrb[1].mxu0 }
  0xf7   :  { %v513_v4 = vmul.f32 0.2, %v1388_v2  ;;  %v237_v5 = vmul.f32 0.2, %v174_v3  ;;  %v448_v6 = vpop.f32.mrb[1].mxu1  ;;  %v1357_v7 = vpop.f32.mrb[2].mxu0 }
  0xf8   :  { %v255_v8 = vmax.f32 %v1356_v0, %v239_v1  ;;  %v511_v9 = vmul.f32 0.2, %v448_v6  ;;  %v240_v10 = vmul.f32 0.2, %v1357_v7  ;;  %v1389_v11 = vpop.f32.mrb[2].mxu1  ;;  %v177_v12 = vpop.f32.mrb[3].mxu0 }
  0xf9   :  { %v529_v13 = vmax.f32 %v1388_v2, %v513_v4  ;;  %v253_v14 = vmax.f32 %v174_v3, %v237_v5  ;;  %v514_v15 = vmul.f32 0.2, %v1389_v11  ;;  %v238_v16 = vmul.f32 0.2, %v177_v12  ;;  %v451_v17 = vpop.f32.mrb[3].mxu1 }
  0xfa   :  { %271 = vst [vmem:[%s1931_s2 + $0x10] sm:$0xff] %v255_v8  ;;  %v527_v18 = vmax.f32 %v448_v6, %v511_v9  ;;  %v256_v19 = vmax.f32 %v1357_v7, %v240_v10  ;;  %v512_v20 = vmul.f32 0.2, %v451_v17 }
  0xfb   :  { %1164 = vst [vmem:[%s1931_s2 + $0x90] sm:$0xff] %v529_v13  ;;  %269 = vst [vmem:[%s1931_s2] sm:$0xff] %v253_v14  ;;  %v530_v21 = vmax.f32 %v1389_v11, %v514_v15  ;;  %v254_v22 = vmax.f32 %v177_v12, %v238_v16 }
  0xfc   :  { %1162 = vst [vmem:[%s1931_s2 + $0x80] sm:$0xff] %v527_v18  ;;  %272 = vst [vmem:[%s1931_s2 + $0x18] sm:$0xff] %v256_v19  ;;  %v528_v23 = vmax.f32 %v451_v17, %v512_v20 }
  0xfd   :  { %1165 = vst [vmem:[%s1931_s2 + $0x98] sm:$0xff] %v530_v21  ;;  %270 = vst [vmem:[%s1931_s2 + $0x8] sm:$0xff] %v254_v22  ;;  %v1360_v24 = vpop.f32.mrb[4].mxu0 }
  0xfe   :  { %1163 = vst [vmem:[%s1931_s2 + $0x88] sm:$0xff] %v528_v23  ;;  %v243_v25 = vmul.f32 0.2, %v1360_v24  ;;  %v1392_v26 = vpop.f32.mrb[4].mxu1  ;;  %v190_v27 = vpop.f32.mrb[5].mxu0 }
  0xff   :  { %v517_v28 = vmul.f32 0.2, %v1392_v26  ;;  %v241_v29 = vmul.f32 0.2, %v190_v27  ;;  %v464_v30 = vpop.f32.mrb[5].mxu1  ;;  %v1361_v31 = vpop.f32.mrb[6].mxu0 }
 0x100   :  { %v259_v32 = vmax.f32 %v1360_v24, %v243_v25  ;;  %v515_v33 = vmul.f32 0.2, %v464_v30  ;;  %v244_v34 = vmul.f32 0.2, %v1361_v31  ;;  %v1393_v35 = vpop.f32.mrb[6].mxu1  ;;  %v193_v36 = vpop.f32.mrb[7].mxu0 }
 0x101   :  { %v533_v37 = vmax.f32 %v1392_v26, %v517_v28  ;;  %v257_v38 = vmax.f32 %v190_v27, %v241_v29  ;;  %v518_v39 = vmul.f32 0.2, %v1393_v35  ;;  %v242_v40 = vmul.f32 0.2, %v193_v36  ;;  %v467_v41 = vpop.f32.mrb[7].mxu1 }
 0x102   :  { %275 = vst [vmem:[%s1931_s2 + $0x30] sm:$0xff] %v259_v32  ;;  %v531_v42 = vmax.f32 %v464_v30, %v515_v33  ;;  %v260_v43 = vmax.f32 %v1361_v31, %v244_v34  ;;  %v516_v44 = vmul.f32 0.2, %v467_v41 }
 0x103   :  { %1168 = vst [vmem:[%s1931_s2 + $0xb0] sm:$0xff] %v533_v37  ;;  %273 = vst [vmem:[%s1931_s2 + $0x20] sm:$0xff] %v257_v38  ;;  %v534_v45 = vmax.f32 %v1393_v35, %v518_v39  ;;  %v258_v46 = vmax.f32 %v193_v36, %v242_v40 }
 0x104   :  { %1166 = vst [vmem:[%s1931_s2 + $0xa0] sm:$0xff] %v531_v42  ;;  %276 = vst [vmem:[%s1931_s2 + $0x38] sm:$0xff] %v260_v43  ;;  %v532_v47 = vmax.f32 %v467_v41, %v516_v44 }
 0x105   :  { %1169 = vst [vmem:[%s1931_s2 + $0xb8] sm:$0xff] %v534_v45  ;;  %274 = vst [vmem:[%s1931_s2 + $0x28] sm:$0xff] %v258_v46  ;;  %v1364_v48 = vpop.f32.mrb[8].mxu0 }
 0x106   :  { %1167 = vst [vmem:[%s1931_s2 + $0xa8] sm:$0xff] %v532_v47  ;;  %v247_v49 = vmul.f32 0.2, %v1364_v48  ;;  %v1396_v50 = vpop.f32.mrb[8].mxu1  ;;  %v206_v51 = vpop.f32.mrb[9].mxu0 }
 0x107   :  { %v521_v52 = vmul.f32 0.2, %v1396_v50  ;;  %v245_v53 = vmul.f32 0.2, %v206_v51  ;;  %v480_v54 = vpop.f32.mrb[9].mxu1  ;;  %v1365_v55 = vpop.f32.mrb[10].mxu0 }
 0x108   :  { %v263_v56 = vmax.f32 %v1364_v48, %v247_v49  ;;  %v519_v57 = vmul.f32 0.2, %v480_v54  ;;  %v248_v58 = vmul.f32 0.2, %v1365_v55  ;;  %v1397_v59 = vpop.f32.mrb[10].mxu1  ;;  %v209_v60 = vpop.f32.mrb[11].mxu0 }
 0x109   :  { %v537_v61 = vmax.f32 %v1396_v50, %v521_v52  ;;  %v261_v62 = vmax.f32 %v206_v51, %v245_v53  ;;  %v522_v63 = vmul.f32 0.2, %v1397_v59  ;;  %v246_v0 = vmul.f32 0.2, %v209_v60  ;;  %v483_v1 = vpop.f32.mrb[11].mxu1 }
 0x10a   :  { %279 = vst [vmem:[%s1931_s2 + $0x50] sm:$0xff] %v263_v56  ;;  %v535_v2 = vmax.f32 %v480_v54, %v519_v57  ;;  %v264_v3 = vmax.f32 %v1365_v55, %v248_v58  ;;  %v520_v4 = vmul.f32 0.2, %v483_v1 }
 0x10b   :  { %1172 = vst [vmem:[%s1931_s2 + $0xd0] sm:$0xff] %v537_v61  ;;  %277 = vst [vmem:[%s1931_s2 + $0x40] sm:$0xff] %v261_v62  ;;  %v538_v5 = vmax.f32 %v1397_v59, %v522_v63  ;;  %v262_v6 = vmax.f32 %v209_v60, %v246_v0 }
 0x10c   :  { %1170 = vst [vmem:[%s1931_s2 + $0xc0] sm:$0xff] %v535_v2  ;;  %280 = vst [vmem:[%s1931_s2 + $0x58] sm:$0xff] %v264_v3  ;;  %v536_v7 = vmax.f32 %v483_v1, %v520_v4 }
 0x10d   :  { %1173 = vst [vmem:[%s1931_s2 + $0xd8] sm:$0xff] %v538_v5  ;;  %278 = vst [vmem:[%s1931_s2 + $0x48] sm:$0xff] %v262_v6  ;;  %v1368_v8 = vpop.f32.mrb[12].mxu0 }
 0x10e   :  { %1171 = vst [vmem:[%s1931_s2 + $0xc8] sm:$0xff] %v536_v7  ;;  %v251_v9 = vmul.f32 0.2, %v1368_v8  ;;  %v1400_v10 = vpop.f32.mrb[12].mxu1  ;;  %v222_v11 = vpop.f32.mrb[13].mxu0 }
 0x10f   :  { %v525_v12 = vmul.f32 0.2, %v1400_v10  ;;  %v249_v13 = vmul.f32 0.2, %v222_v11  ;;  %v496_v14 = vpop.f32.mrb[13].mxu1  ;;  %v1369_v15 = vpop.f32.mrb[14].mxu0 }
 0x110   :  { %v267_v16 = vmax.f32 %v1368_v8, %v251_v9  ;;  %v523_v17 = vmul.f32 0.2, %v496_v14  ;;  %v252_v18 = vmul.f32 0.2, %v1369_v15  ;;  %v1401_v19 = vpop.f32.mrb[14].mxu1  ;;  %v225_v20 = vpop.f32.mrb[15].mxu0 }
 0x111   :  { %v541_v21 = vmax.f32 %v1400_v10, %v525_v12  ;;  %v265_v22 = vmax.f32 %v222_v11, %v249_v13  ;;  %v526_v23 = vmul.f32 0.2, %v1401_v19  ;;  %v250_v24 = vmul.f32 0.2, %v225_v20  ;;  %v499_v25 = vpop.f32.mrb[15].mxu1 }
 0x112   :  { %283 = vst [vmem:[%s1931_s2 + $0x70] sm:$0xff] %v267_v16  ;;  %v539_v26 = vmax.f32 %v496_v14, %v523_v17  ;;  %v268_v27 = vmax.f32 %v1369_v15, %v252_v18  ;;  %v524_v28 = vmul.f32 0.2, %v499_v25 }
 0x113   :  { %1176 = vst [vmem:[%s1931_s2 + $0xf0] sm:$0xff] %v541_v21  ;;  %281 = vst [vmem:[%s1931_s2 + $0x60] sm:$0xff] %v265_v22  ;;  %v542_v29 = vmax.f32 %v1401_v19, %v526_v23  ;;  %v266_v30 = vmax.f32 %v225_v20, %v250_v24 }
 0x114   :  { %1174 = vst [vmem:[%s1931_s2 + $0xe0] sm:$0xff] %v539_v26  ;;  %284 = vst [vmem:[%s1931_s2 + $0x78] sm:$0xff] %v268_v27  ;;  %v540_v31 = vmax.f32 %v499_v25, %v524_v28 }
 0x115   :  { %1177 = vst [vmem:[%s1931_s2 + $0xf8] sm:$0xff] %v542_v29  ;;  %282 = vst [vmem:[%s1931_s2 + $0x68] sm:$0xff] %v266_v30  ;;  %v1420_v32 = vpop.f32.mrb[16].mxu0 }
 0x116   :  { %1175 = vst [vmem:[%s1931_s2 + $0xe8] sm:$0xff] %v540_v31  ;;  %v788_v33 = vmul.f32 0.2, %v1420_v32  ;;  %v1452_v34 = vpop.f32.mrb[16].mxu1  ;;  %v723_v35 = vpop.f32.mrb[17].mxu0 }
 0x117   :  { %v1063_v36 = vmul.f32 0.2, %v1452_v34  ;;  %v786_v37 = vmul.f32 0.2, %v723_v35  ;;  %v998_v38 = vpop.f32.mrb[17].mxu1  ;;  %v1421_v39 = vpop.f32.mrb[18].mxu0 }
 0x118   :  { %v804_v40 = vmax.f32 %v1420_v32, %v788_v33  ;;  %v1061_v41 = vmul.f32 0.2, %v998_v38  ;;  %v789_v42 = vmul.f32 0.2, %v1421_v39  ;;  %v1453_v43 = vpop.f32.mrb[18].mxu1  ;;  %v726_v44 = vpop.f32.mrb[19].mxu0 }
 0x119   :  { %v1079_v45 = vmax.f32 %v1452_v34, %v1063_v36  ;;  %v802_v46 = vmax.f32 %v723_v35, %v786_v37  ;;  %v1064_v47 = vmul.f32 0.2, %v1453_v43  ;;  %v787_v48 = vmul.f32 0.2, %v726_v44  ;;  %v1001_v49 = vpop.f32.mrb[19].mxu1 }
 0x11a   :  { %1212 = vst [vmem:[%s1931_s2 + $0x110] sm:$0xff] %v804_v40  ;;  %v1077_v50 = vmax.f32 %v998_v38, %v1061_v41  ;;  %v805_v51 = vmax.f32 %v1421_v39, %v789_v42  ;;  %v1062_v52 = vmul.f32 0.2, %v1001_v49 }
 0x11b   :  { %1260 = vst [vmem:[%s1931_s2 + $0x190] sm:$0xff] %v1079_v45  ;;  %1210 = vst [vmem:[%s1931_s2 + $0x100] sm:$0xff] %v802_v46  ;;  %v1080_v53 = vmax.f32 %v1453_v43, %v1064_v47  ;;  %v803_v54 = vmax.f32 %v726_v44, %v787_v48 }
 0x11c   :  { %1258 = vst [vmem:[%s1931_s2 + $0x180] sm:$0xff] %v1077_v50  ;;  %1213 = vst [vmem:[%s1931_s2 + $0x118] sm:$0xff] %v805_v51  ;;  %v1078_v55 = vmax.f32 %v1001_v49, %v1062_v52 }
 0x11d   :  { %1261 = vst [vmem:[%s1931_s2 + $0x198] sm:$0xff] %v1080_v53  ;;  %1211 = vst [vmem:[%s1931_s2 + $0x108] sm:$0xff] %v803_v54  ;;  %v1424_v56 = vpop.f32.mrb[20].mxu0 }
 0x11e   :  { %1259 = vst [vmem:[%s1931_s2 + $0x188] sm:$0xff] %v1078_v55  ;;  %v792_v57 = vmul.f32 0.2, %v1424_v56  ;;  %v1456_v58 = vpop.f32.mrb[20].mxu1  ;;  %v739_v59 = vpop.f32.mrb[21].mxu0 }
 0x11f   :  { %v1067_v60 = vmul.f32 0.2, %v1456_v58  ;;  %v790_v61 = vmul.f32 0.2, %v739_v59  ;;  %v1014_v62 = vpop.f32.mrb[21].mxu1  ;;  %v1425_v63 = vpop.f32.mrb[22].mxu0 }
 0x120   :  { %v808_v0 = vmax.f32 %v1424_v56, %v792_v57  ;;  %v1065_v1 = vmul.f32 0.2, %v1014_v62  ;;  %v793_v2 = vmul.f32 0.2, %v1425_v63  ;;  %v1457_v3 = vpop.f32.mrb[22].mxu1  ;;  %v742_v4 = vpop.f32.mrb[23].mxu0 }
 0x121   :  { %v1083_v5 = vmax.f32 %v1456_v58, %v1067_v60  ;;  %v806_v6 = vmax.f32 %v739_v59, %v790_v61  ;;  %v1068_v7 = vmul.f32 0.2, %v1457_v3  ;;  %v791_v8 = vmul.f32 0.2, %v742_v4  ;;  %v1017_v9 = vpop.f32.mrb[23].mxu1 }
 0x122   :  { %1216 = vst [vmem:[%s1931_s2 + $0x130] sm:$0xff] %v808_v0  ;;  %v1081_v10 = vmax.f32 %v1014_v62, %v1065_v1  ;;  %v809_v11 = vmax.f32 %v1425_v63, %v793_v2  ;;  %v1066_v12 = vmul.f32 0.2, %v1017_v9 }
 0x123   :  { %1264 = vst [vmem:[%s1931_s2 + $0x1b0] sm:$0xff] %v1083_v5  ;;  %1214 = vst [vmem:[%s1931_s2 + $0x120] sm:$0xff] %v806_v6  ;;  %v1084_v13 = vmax.f32 %v1457_v3, %v1068_v7  ;;  %v807_v14 = vmax.f32 %v742_v4, %v791_v8 }
 0x124   :  { %1262 = vst [vmem:[%s1931_s2 + $0x1a0] sm:$0xff] %v1081_v10  ;;  %1217 = vst [vmem:[%s1931_s2 + $0x138] sm:$0xff] %v809_v11  ;;  %v1082_v15 = vmax.f32 %v1017_v9, %v1066_v12 }
 0x125   :  { %1265 = vst [vmem:[%s1931_s2 + $0x1b8] sm:$0xff] %v1084_v13  ;;  %1215 = vst [vmem:[%s1931_s2 + $0x128] sm:$0xff] %v807_v14  ;;  %v1428_v16 = vpop.f32.mrb[24].mxu0 }
 0x126   :  { %1263 = vst [vmem:[%s1931_s2 + $0x1a8] sm:$0xff] %v1082_v15  ;;  %v796_v17 = vmul.f32 0.2, %v1428_v16  ;;  %v1460_v18 = vpop.f32.mrb[24].mxu1  ;;  %v755_v19 = vpop.f32.mrb[25].mxu0 }
 0x127   :  { %v1071_v20 = vmul.f32 0.2, %v1460_v18  ;;  %v794_v21 = vmul.f32 0.2, %v755_v19  ;;  %v1030_v22 = vpop.f32.mrb[25].mxu1  ;;  %v1429_v23 = vpop.f32.mrb[26].mxu0 }
 0x128   :  { %v812_v24 = vmax.f32 %v1428_v16, %v796_v17  ;;  %v1069_v25 = vmul.f32 0.2, %v1030_v22  ;;  %v797_v26 = vmul.f32 0.2, %v1429_v23  ;;  %v1461_v27 = vpop.f32.mrb[26].mxu1  ;;  %v758_v28 = vpop.f32.mrb[27].mxu0 }
 0x129   :  { %v1087_v29 = vmax.f32 %v1460_v18, %v1071_v20  ;;  %v810_v30 = vmax.f32 %v755_v19, %v794_v21  ;;  %v1072_v31 = vmul.f32 0.2, %v1461_v27  ;;  %v795_v32 = vmul.f32 0.2, %v758_v28  ;;  %v1033_v33 = vpop.f32.mrb[27].mxu1 }
 0x12a   :  { %1220 = vst [vmem:[%s1931_s2 + $0x150] sm:$0xff] %v812_v24  ;;  %v1085_v34 = vmax.f32 %v1030_v22, %v1069_v25  ;;  %v813_v35 = vmax.f32 %v1429_v23, %v797_v26  ;;  %v1070_v36 = vmul.f32 0.2, %v1033_v33 }
 0x12b   :  { %1268 = vst [vmem:[%s1931_s2 + $0x1d0] sm:$0xff] %v1087_v29  ;;  %1218 = vst [vmem:[%s1931_s2 + $0x140] sm:$0xff] %v810_v30  ;;  %v1088_v37 = vmax.f32 %v1461_v27, %v1072_v31  ;;  %v811_v38 = vmax.f32 %v758_v28, %v795_v32 }
 0x12c   :  { %1266 = vst [vmem:[%s1931_s2 + $0x1c0] sm:$0xff] %v1085_v34  ;;  %1221 = vst [vmem:[%s1931_s2 + $0x158] sm:$0xff] %v813_v35  ;;  %v1086_v39 = vmax.f32 %v1033_v33, %v1070_v36 }
 0x12d   :  { %1269 = vst [vmem:[%s1931_s2 + $0x1d8] sm:$0xff] %v1088_v37  ;;  %1219 = vst [vmem:[%s1931_s2 + $0x148] sm:$0xff] %v811_v38  ;;  %v1432_v40 = vpop.f32.mrb[28].mxu0 }
 0x12e   :  { %1267 = vst [vmem:[%s1931_s2 + $0x1c8] sm:$0xff] %v1086_v39  ;;  %v800_v41 = vmul.f32 0.2, %v1432_v40  ;;  %v1464_v42 = vpop.f32.mrb[28].mxu1  ;;  %v771_v43 = vpop.f32.mrb[29].mxu0 }
 0x12f   :  { %v1075_v44 = vmul.f32 0.2, %v1464_v42  ;;  %v798_v45 = vmul.f32 0.2, %v771_v43  ;;  %v1046_v46 = vpop.f32.mrb[29].mxu1  ;;  %v1433_v47 = vpop.f32.mrb[30].mxu0 }
 0x130   :  { %v816_v48 = vmax.f32 %v1432_v40, %v800_v41  ;;  %v1073_v49 = vmul.f32 0.2, %v1046_v46  ;;  %v801_v50 = vmul.f32 0.2, %v1433_v47  ;;  %v1465_v51 = vpop.f32.mrb[30].mxu1  ;;  %v774_v52 = vpop.f32.mrb[31].mxu0 }
 0x131   :  { %v1091_v53 = vmax.f32 %v1464_v42, %v1075_v44  ;;  %v814_v54 = vmax.f32 %v771_v43, %v798_v45  ;;  %v1076_v55 = vmul.f32 0.2, %v1465_v51  ;;  %v799_v56 = vmul.f32 0.2, %v774_v52  ;;  %v1049_v57 = vpop.f32.mrb[31].mxu1 }
 0x132   :  { %1224 = vst [vmem:[%s1931_s2 + $0x170] sm:$0xff] %v816_v48  ;;  %v1089_v58 = vmax.f32 %v1046_v46, %v1073_v49  ;;  %v817_v59 = vmax.f32 %v1433_v47, %v801_v50  ;;  %v1074_v60 = vmul.f32 0.2, %v1049_v57 }
 0x133   :  { %1272 = vst [vmem:[%s1931_s2 + $0x1f0] sm:$0xff] %v1091_v53  ;;  %1222 = vst [vmem:[%s1931_s2 + $0x160] sm:$0xff] %v814_v54  ;;  %v1092_v61 = vmax.f32 %v1465_v51, %v1076_v55  ;;  %v815_v62 = vmax.f32 %v774_v52, %v799_v56 }
 0x134   :  { %1270 = vst [vmem:[%s1931_s2 + $0x1e0] sm:$0xff] %v1089_v58  ;;  %1225 = vst [vmem:[%s1931_s2 + $0x178] sm:$0xff] %v817_v59  ;;  %v1090_v63 = vmax.f32 %v1049_v57, %v1074_v60 }
 0x135   :  { %1273 = vst [vmem:[%s1931_s2 + $0x1f8] sm:$0xff] %v1092_v61  ;;  %1223 = vst [vmem:[%s1931_s2 + $0x168] sm:$0xff] %v815_v62 }
 0x136   :  { %1271 = vst [vmem:[%s1931_s2 + $0x1e8] sm:$0xff] %v1090_v63 }

// kernel: discriminator_forward.8
= control target key start
LH: loop header
LB: loop body
LE: loop exit
PB: predicated region body
PF: predicated region fallthrough
CT: control target
= control target key end

     0   :  { %s288_s0 = inlined_call_operand.vmem [shape: f32[128,128], index: 0, kind: input, shape index: {}]   ;;  %s289_s1 = inlined_call_operand.vmem [shape: f32[1,128], index: 1, kind: input, shape index: {}]   ;;  %s290_s2 = inlined_call_operand.vmem [shape: f32[1,128], index: 2, kind: input, shape index: {}]   ;;  %s291_s3 = inlined_call_operand.vmem [shape: f32[128,128], index: 3, kind: output, shape index: {}]  }
   0x1   :  { %v14_v0 = vld [vmem:[%s288_s0] sm:$0xff]  ;;  %v15_v4 = vld [vmem:[%s288_s0 + $0x8] sm:$0xff]  ;;  %v16_v5 = vld [vmem:[%s288_s0 + $0x10] sm:$0xff] }
   0x2   :  { %v156_v1 = vld [vmem:[%s289_s1] ss:$0 sm:$0xff]  ;;  %v17_v6 = vld [vmem:[%s288_s0 + $0x18] sm:$0xff]  ;;  %v19_v11 = vld [vmem:[%s288_s0 + $0x28] sm:$0xff] }
   0x3   :  { %v161_v2 = vld [vmem:[%s290_s2] ss:$0 sm:$0xff]  ;;  %v37_v3 = vmul.f32 %v156_v1, %v14_v0  ;;  %v38_v7 = vmul.f32 %v156_v1, %v15_v4  ;;  %v39_v8 = vmul.f32 %v156_v1, %v16_v5  ;;  %v40_v9 = vmul.f32 %v156_v1, %v17_v6  ;;  %v20_v12 = vld [vmem:[%s288_s0 + $0x30] sm:$0xff]  ;;  %v21_v17 = vld [vmem:[%s288_s0 + $0x38] sm:$0xff] }
   0x4   :  { %v18_v10 = vld [vmem:[%s288_s0 + $0x20] sm:$0xff]  ;;  %v42_v15 = vmul.f32 %v156_v1, %v19_v11  ;;  %v43_v16 = vmul.f32 %v156_v1, %v20_v12  ;;  %v44_v21 = vmul.f32 %v156_v1, %v21_v17  ;;  %v23_v27 = vld [vmem:[%s288_s0 + $0x48] sm:$0xff]  ;;  %v24_v28 = vld [vmem:[%s288_s0 + $0x50] sm:$0xff] }
   0x5   :  { %v60_v13 = vadd.f32 %v161_v2, %v37_v3  ;;  %v41_v14 = vmul.f32 %v156_v1, %v18_v10  ;;  %v61_v18 = vadd.f32 %v161_v2, %v38_v7  ;;  %v62_v19 = vadd.f32 %v161_v2, %v39_v8  ;;  %v22_v22 = vld [vmem:[%s288_s0 + $0x40] sm:$0xff]  ;;  %v25_v29 = vld [vmem:[%s288_s0 + $0x58] sm:$0xff]  ;;  %v27_v43 = vld [vmem:[%s288_s0 + $0x68] sm:$0xff] }
   0x6   :  { %v63_v20 = vadd.f32 %v161_v2, %v40_v9  ;;  %v65_v25 = vadd.f32 %v161_v2, %v42_v15  ;;  %v66_v26 = vadd.f32 %v161_v2, %v43_v16  ;;  %v67_v33 = vadd.f32 %v161_v2, %v44_v21  ;;  %v26_v42 = vld [vmem:[%s288_s0 + $0x60] sm:$0xff]  ;;  %v28_v44 = vld [vmem:[%s288_s0 + $0x70] sm:$0xff]  ;;  %v29_v49 = vld [vmem:[%s288_s0 + $0x78] sm:$0xff] }
   0x7   :  { %v76_v23 = vmul.f32 0.2, %v60_v13  ;;  %v64_v24 = vadd.f32 %v161_v2, %v41_v14  ;;  %v77_v30 = vmul.f32 0.2, %v61_v18  ;;  %v78_v31 = vmul.f32 0.2, %v62_v19 }
   0x8   :  { %v79_v32 = vmul.f32 0.2, %v63_v20  ;;  %v81_v36 = vmul.f32 0.2, %v65_v25  ;;  %v82_v37 = vmul.f32 0.2, %v66_v26  ;;  %v45_v48 = vmul.f32 %v156_v1, %v22_v22 }
   0x9   :  { %v92_v34 = vmax.f32 %v60_v13, %v76_v23  ;;  %v80_v35 = vmul.f32 0.2, %v64_v24  ;;  %v93_v38 = vmax.f32 %v61_v18, %v77_v30  ;;  %v94_v39 = vmax.f32 %v62_v19, %v78_v31 }
   0xa   :  { %v95_v40 = vmax.f32 %v63_v20, %v79_v32  ;;  %v83_v41 = vmul.f32 0.2, %v67_v33  ;;  %v97_v46 = vmax.f32 %v65_v25, %v81_v36  ;;  %v98_v47 = vmax.f32 %v66_v26, %v82_v37 }
   0xb   :  { %108 = vst [vmem:[%s291_s3] sm:$0xff] %v92_v34  ;;  %v96_v45 = vmax.f32 %v64_v24, %v80_v35  ;;  %109 = vst [vmem:[%s291_s3 + $0x8] sm:$0xff] %v93_v38  ;;  %v46_v51 = vmul.f32 %v156_v1, %v23_v27  ;;  %v47_v52 = vmul.f32 %v156_v1, %v24_v28 }
   0xc   :  { %110 = vst [vmem:[%s291_s3 + $0x10] sm:$0xff] %v94_v39  ;;  %111 = vst [vmem:[%s291_s3 + $0x18] sm:$0xff] %v95_v40  ;;  %v99_v50 = vmax.f32 %v67_v33, %v83_v41  ;;  %v48_v53 = vmul.f32 %v156_v1, %v25_v29  ;;  %v68_v54 = vadd.f32 %v161_v2, %v45_v48 }
   0xd   :  { %112 = vst [vmem:[%s291_s3 + $0x20] sm:$0xff] %v96_v45  ;;  %113 = vst [vmem:[%s291_s3 + $0x28] sm:$0xff] %v97_v46  ;;  %v49_v55 = vmul.f32 %v156_v1, %v26_v42  ;;  %v50_v56 = vmul.f32 %v156_v1, %v27_v43  ;;  %v51_v57 = vmul.f32 %v156_v1, %v28_v44 }
   0xe   :  { %114 = vst [vmem:[%s291_s3 + $0x30] sm:$0xff] %v98_v47  ;;  %115 = vst [vmem:[%s291_s3 + $0x38] sm:$0xff] %v99_v50  ;;  %v69_v58 = vadd.f32 %v161_v2, %v46_v51  ;;  %v70_v59 = vadd.f32 %v161_v2, %v47_v52  ;;  %v71_v60 = vadd.f32 %v161_v2, %v48_v53  ;;  %v84_v62 = vmul.f32 0.2, %v68_v54 }
   0xf   :  { %v52_v61 = vmul.f32 %v156_v1, %v29_v49  ;;  %v72_v63 = vadd.f32 %v161_v2, %v49_v55  ;;  %v73_v0 = vadd.f32 %v161_v2, %v50_v56  ;;  %v74_v3 = vadd.f32 %v161_v2, %v51_v57 }
  0x10   :  { %v85_v4 = vmul.f32 0.2, %v69_v58  ;;  %v86_v5 = vmul.f32 0.2, %v70_v59  ;;  %v87_v6 = vmul.f32 0.2, %v71_v60  ;;  %v100_v8 = vmax.f32 %v68_v54, %v84_v62 }
  0x11   :  { %v75_v7 = vadd.f32 %v161_v2, %v52_v61  ;;  %v88_v9 = vmul.f32 0.2, %v72_v63  ;;  %v89_v10 = vmul.f32 0.2, %v73_v0  ;;  %v90_v11 = vmul.f32 0.2, %v74_v3 }
  0x12   :  { %v101_v12 = vmax.f32 %v69_v58, %v85_v4  ;;  %v102_v13 = vmax.f32 %v70_v59, %v86_v5  ;;  %v103_v14 = vmax.f32 %v71_v60, %v87_v6  ;;  %116 = vst [vmem:[%s291_s3 + $0x40] sm:$0xff] %v100_v8 }
  0x13   :  { %v91_v1 = vmul.f32 0.2, %v75_v7  ;;  %v104_v15 = vmax.f32 %v72_v63, %v88_v9  ;;  %v105_v16 = vmax.f32 %v73_v0, %v89_v10  ;;  %v106_v17 = vmax.f32 %v74_v3, %v90_v11 }
  0x14   :  { %117 = vst [vmem:[%s291_s3 + $0x48] sm:$0xff] %v101_v12  ;;  %118 = vst [vmem:[%s291_s3 + $0x50] sm:$0xff] %v102_v13 }
  0x15   :  { %119 = vst [vmem:[%s291_s3 + $0x58] sm:$0xff] %v103_v14  ;;  %v107_v2 = vmax.f32 %v75_v7, %v91_v1  ;;  %120 = vst [vmem:[%s291_s3 + $0x60] sm:$0xff] %v104_v15 }
  0x16   :  { %121 = vst [vmem:[%s291_s3 + $0x68] sm:$0xff] %v105_v16  ;;  %122 = vst [vmem:[%s291_s3 + $0x70] sm:$0xff] %v106_v17 }
  0x17   :  { %123 = vst [vmem:[%s291_s3 + $0x78] sm:$0xff] %v107_v2 }

// kernel: discriminator_forward.9
= control target key start
LH: loop header
LB: loop body
LE: loop exit
PB: predicated region body
PF: predicated region fallthrough
CT: control target
= control target key end

     0   :  { %v356_v20 = vmov 0.0   ;;  %s472_s1 = inlined_call_operand.vmem [shape: bf16[256,128], index: 1, kind: input, shape index: {}]   ;;  %s473_s0 = inlined_call_operand.vmem [shape: bf16[32,256], index: 0, kind: input, shape index: {}]   ;;  %s474_s3 = inlined_call_operand.vmem [shape: f32[1,128], index: 3, kind: output, shape index: {1}]   ;;  %s475_s4 = inlined_call_operand.vmem [shape: f32[1,128], index: 4, kind: output, shape index: {2}]   ;;  %s476_s2 = inlined_call_operand.vmem [shape: f32[32,128], index: 2, kind: output, shape index: {0}]  }
   0x1   :  { %v334_v0 = vld [vmem:[%s472_s1 + $0x40] sm:$0xff]   ;;  %v336_v2 = vld [vmem:[%s472_s1 + $0x48] sm:$0xff]   ;;  %v338_v4 = vld [vmem:[%s472_s1 + $0x50] sm:$0xff]   ;;  %19 = vst [vmem:[%s474_s3] sm:$0x1] %v356_v20 }
   0x2   :  { %v335_v1 = vld [vmem:[%s472_s1] sm:$0xff]   ;;  %289 = vmatprep.subr.bf16.mxu0 %v334_v0  ;;  %317 = vmatprep.subr.bf16.mxu1 %v334_v0  ;;  %v337_v3 = vld [vmem:[%s472_s1 + $0x8] sm:$0xff]   ;;  %v339_v5 = vld [vmem:[%s472_s1 + $0x10] sm:$0xff]   ;;  %20 = vst [vmem:[%s475_s4] sm:$0x1] %v356_v20 }
   0x3   :  { %290 = vmatpush3.bf16.msra.mxu0 %v335_v1  ;;  %325 = vmatpush3.bf16.msra.mxu1 %v335_v1  ;;  %v340_v6 = vld [vmem:[%s472_s1 + $0x58] sm:$0xff]   ;;  %v342_v8 = vld [vmem:[%s472_s1 + $0x60] sm:$0xff]   ;;  %v344_v10 = vld [vmem:[%s472_s1 + $0x68] sm:$0xff]  }
   0x4   :  { %291 = vmatprep.subr.bf16.mxu0 %v336_v2  ;;  %318 = vmatprep.subr.bf16.mxu1 %v336_v2  ;;  %v341_v7 = vld [vmem:[%s472_s1 + $0x18] sm:$0xff]   ;;  %v343_v9 = vld [vmem:[%s472_s1 + $0x20] sm:$0xff]   ;;  %v345_v13 = vld [vmem:[%s472_s1 + $0x28] sm:$0xff]  }
   0x5   :  { %v352_v11 = vld [vmem:[%s473_s0 + $0x4] ss:$8 sps:$4 sm:$0xff]   ;;  %v355_v12 = vld [vmem:[%s473_s0 + $0x14] ss:$8 sps:$4 sm:$0xff]   ;;  %v350_v18 = vld [vmem:[%s473_s0] ss:$8 sps:$4 sm:$0xff]  }
   0x6   :  { %v346_v14 = vld [vmem:[%s472_s1 + $0x70] sm:$0xff]   ;;  %208 = vmatprep.mubr.bf16.mxu0 %v352_v11  ;;  %216 = vmatprep.mubr.bf16.mxu1 %v355_v12  ;;  %v348_v16 = vld [vmem:[%s472_s1 + $0x78] sm:$0xff]  }
   0x7   :  { %292 = vmatpush3.bf16.msra.mxu0 %v337_v3  ;;  %326 = vmatpush3.bf16.msra.mxu1 %v337_v3  ;;  %v347_v15 = vld [vmem:[%s472_s1 + $0x30] sm:$0xff]   ;;  %v349_v17 = vld [vmem:[%s472_s1 + $0x38] sm:$0xff]  }
   0x8   :  { %293 = vmatprep.subr.bf16.mxu0 %v338_v4  ;;  %319 = vmatprep.subr.bf16.mxu1 %v338_v4  ;;  %v353_v19 = vld [vmem:[%s473_s0 + $0x10] ss:$8 sps:$4 sm:$0xff]   ;;  %v229_v52 = vld [vmem:[%s474_s3] sm:$0x1] }
   0x9   :  { %v241_v55 = vld [vmem:[%s475_s4] sm:$0x1] }
   0xb   :  { %294 = vmatpush3.bf16.msra.mxu0 %v339_v5  ;;  %327 = vmatpush3.bf16.msra.mxu1 %v339_v5 }
   0xc   :  { %295 = vmatprep.subr.bf16.mxu0 %v340_v6  ;;  %320 = vmatprep.subr.bf16.mxu1 %v340_v6 }
   0xf   :  { %296 = vmatpush3.bf16.msra.mxu0 %v341_v7  ;;  %328 = vmatpush3.bf16.msra.mxu1 %v341_v7 }
  0x10   :  { %297 = vmatprep.subr.bf16.mxu0 %v342_v8  ;;  %321 = vmatprep.subr.bf16.mxu1 %v342_v8 }
  0x13   :  { %298 = vmatpush3.bf16.msra.mxu0 %v343_v9  ;;  %329 = vmatpush3.bf16.msra.mxu1 %v343_v9 }
  0x14   :  { %299 = vmatprep.subr.bf16.mxu0 %v344_v10  ;;  %322 = vmatprep.subr.bf16.mxu1 %v344_v10 }
  0x17   :  { %300 = vmatpush3.bf16.msra.mxu0 %v345_v13  ;;  %330 = vmatpush3.bf16.msra.mxu1 %v345_v13 }
  0x18   :  { %301 = vmatprep.subr.bf16.mxu0 %v346_v14  ;;  %323 = vmatprep.subr.bf16.mxu1 %v346_v14 }
  0x1b   :  { %302 = vmatpush3.bf16.msra.mxu0 %v347_v15  ;;  %331 = vmatpush3.bf16.msra.mxu1 %v347_v15 }
  0x1c   :  { %303 = vmatprep.subr.bf16.mxu0 %v348_v16  ;;  %324 = vmatprep.subr.bf16.mxu1 %v348_v16 }
  0x1f   :  { %304 = vmatpush3.bf16.msra.mxu0 %v349_v17  ;;  %332 = vmatpush3.bf16.msra.mxu1 %v349_v17 }
  0x22   :  { %209 = vmatmul.mubr.bf16.vlgmr.msra.gmra.mrb[0].mxu0 %v350_v18  ;;  %217 = vmatmul.mubr.bf16.vlgmr.msra.gmra.mrb[0].mxu1 %v353_v19 }
  0xf5   :  { %v305_v21 = vpop.f32.mrb[0].mxu0  ;;  %v311_v22 = vpop.f32.mrb[0].mxu1 }
  0xf6   :  { %v306_v23 = vpop.f32.mrb[1].mxu0  ;;  %v312_v24 = vpop.f32.mrb[1].mxu1 }
  0xf7   :  { %v307_v25 = vadd.f32 %v306_v23, %v305_v21  ;;  %v308_v26 = vpop.f32.mrb[2].mxu0  ;;  %v313_v27 = vadd.f32 %v312_v24, %v311_v22  ;;  %v314_v28 = vpop.f32.mrb[2].mxu1 }
  0xf8   :  { %v309_v29 = vpop.f32.mrb[3].mxu0  ;;  %v315_v30 = vpop.f32.mrb[3].mxu1 }
  0xf9   :  { %225 = vst [vmem:[%s476_s2] sm:$0xff] %v307_v25  ;;  %227 = vst [vmem:[%s476_s2 + $0x10] sm:$0xff] %v313_v27  ;;  %v310_v31 = vadd.f32 %v309_v29, %v308_v26  ;;  %v316_v32 = vadd.f32 %v315_v30, %v314_v28  ;;  %v242_v33 = vmul.f32 %v307_v25, %v307_v25 }
  0xfa   :  { %v244_v34 = vmul.f32 %v313_v27, %v313_v27 }
  0xfb   :  { %226 = vst [vmem:[%s476_s2 + $0x8] sm:$0xff] %v310_v31  ;;  %v230_v35 = vadd.f32 %v310_v31, %v307_v25  ;;  %v243_v36 = vmul.f32 %v310_v31, %v310_v31  ;;  %228 = vst [vmem:[%s476_s2 + $0x18] sm:$0xff] %v316_v32  ;;  %v245_v40 = vmul.f32 %v316_v32, %v316_v32 }
  0xfd   :  { %v246_v37 = vadd.f32 %v243_v36, %v242_v33  ;;  %v231_v38 = vadd.f32 %v313_v27, %v230_v35 }
  0xff   :  { %v232_v39 = vadd.f32 %v316_v32, %v231_v38  ;;  %v247_v41 = vadd.f32 %v246_v37, %v244_v34 }
 0x101   :  { %v233_v42 = vrot.slane %v232_v39, 4  ;;  %v248_v43 = vadd.f32 %v247_v41, %v245_v40 }
 0x103   :  { %v234_v44 = vadd.f32 %v233_v42, %v232_v39  ;;  %v249_v45 = vrot.slane %v248_v43, 4 }
 0x105   :  { %v235_v46 = vrot.slane %v234_v44, 2  ;;  %v250_v47 = vadd.f32 %v249_v45, %v248_v43 }
 0x107   :  { %v236_v48 = vadd.f32 %v235_v46, %v234_v44  ;;  %v251_v49 = vrot.slane %v250_v47, 2 }
 0x109   :  { %v237_v50 = vrot.slane %v236_v48, 1  ;;  %v252_v51 = vadd.f32 %v251_v49, %v250_v47 }
 0x10b   :  { %v238_v53 = vadd.f32 %v237_v50, %v236_v48  ;;  %v253_v54 = vrot.slane %v252_v51, 1 }
 0x10d   :  { %v239_v56 = vadd.f32 %v238_v53, %v229_v52  ;;  %v254_v57 = vadd.f32 %v253_v54, %v252_v51 }
 0x10f   :  { %240 = vst [vmem:[%s474_s3] sm:$0x1] %v239_v56  ;;  %v255_v58 = vadd.f32 %v254_v57, %v241_v55 }
 0x111   :  { %256 = vst [vmem:[%s475_s4] sm:$0x1] %v255_v58 }

// kernel: discriminator_forward.10
= control target key start
LH: loop header
LB: loop body
LE: loop exit
PB: predicated region body
PF: predicated region fallthrough
CT: control target
= control target key end

     0   :  { %s108_s0 = inlined_call_operand.vmem [shape: f32[32,128], index: 0, kind: input, shape index: {}]   ;;  %s109_s1 = inlined_call_operand.vmem [shape: f32[1,128], index: 1, kind: input, shape index: {}]   ;;  %s110_s2 = inlined_call_operand.vmem [shape: f32[1,128], index: 2, kind: input, shape index: {}]   ;;  %s111_s3 = inlined_call_operand.vmem [shape: f32[32,128], index: 3, kind: output, shape index: {}]  }
   0x1   :  { %v14_v0 = vld [vmem:[%s108_s0] sm:$0xff]  ;;  %v15_v4 = vld [vmem:[%s108_s0 + $0x8] sm:$0xff]  ;;  %v16_v5 = vld [vmem:[%s108_s0 + $0x10] sm:$0xff] }
   0x2   :  { %v56_v1 = vld [vmem:[%s109_s1] ss:$0 sm:$0xff]  ;;  %v17_v6 = vld [vmem:[%s108_s0 + $0x18] sm:$0xff] }
   0x3   :  { %v57_v2 = vld [vmem:[%s110_s2] ss:$0 sm:$0xff]  ;;  %v25_v3 = vmul.f32 %v56_v1, %v14_v0  ;;  %v26_v7 = vmul.f32 %v56_v1, %v15_v4  ;;  %v27_v8 = vmul.f32 %v56_v1, %v16_v5  ;;  %v28_v9 = vmul.f32 %v56_v1, %v17_v6 }
   0x5   :  { %v36_v10 = vadd.f32 %v57_v2, %v25_v3  ;;  %v37_v11 = vadd.f32 %v57_v2, %v26_v7  ;;  %v38_v12 = vadd.f32 %v57_v2, %v27_v8  ;;  %v39_v13 = vadd.f32 %v57_v2, %v28_v9 }
   0x7   :  { %v40_v14 = vmul.f32 0.2, %v36_v10  ;;  %v41_v15 = vmul.f32 0.2, %v37_v11  ;;  %v42_v16 = vmul.f32 0.2, %v38_v12 }
   0x8   :  { %v43_v17 = vmul.f32 0.2, %v39_v13 }
   0x9   :  { %v44_v18 = vmax.f32 %v36_v10, %v40_v14  ;;  %v45_v19 = vmax.f32 %v37_v11, %v41_v15  ;;  %v46_v20 = vmax.f32 %v38_v12, %v42_v16 }
   0xa   :  { %v47_v21 = vmax.f32 %v39_v13, %v43_v17 }
   0xb   :  { %48 = vst [vmem:[%s111_s3] sm:$0xff] %v44_v18  ;;  %49 = vst [vmem:[%s111_s3 + $0x8] sm:$0xff] %v45_v19 }
   0xc   :  { %50 = vst [vmem:[%s111_s3 + $0x10] sm:$0xff] %v46_v20  ;;  %51 = vst [vmem:[%s111_s3 + $0x18] sm:$0xff] %v47_v21 }

// kernel: discriminator_forward.11
= control target key start
LH: loop header
LB: loop body
LE: loop exit
PB: predicated region body
PF: predicated region fallthrough
CT: control target
= control target key end

     0   :  { %s630_s1 = inlined_call_operand.vmem [shape: bf16[512,128], index: 1, kind: input, shape index: {}]   ;;  %s631_s0 = inlined_call_operand.vmem [shape: bf16[16,512], index: 0, kind: input, shape index: {}]   ;;  %s632_s2 = inlined_call_operand.vmem [shape: f32[16,128], index: 2, kind: output, shape index: {}]  }
   0x1   :  { %v463_v0 = vld [vmem:[%s630_s1 + $0x40] sm:$0xff]   ;;  %v467_v4 = vld [vmem:[%s630_s1 + $0x48] sm:$0xff]   ;;  %v471_v8 = vld [vmem:[%s630_s1 + $0x50] sm:$0xff]  }
   0x2   :  { %v464_v1 = vld [vmem:[%s630_s1 + $0xc0] sm:$0xff]   ;;  %419 = vmatprep.subr.bf16.mxu0 %v463_v0  ;;  %v468_v5 = vld [vmem:[%s630_s1 + $0xc8] sm:$0xff]   ;;  %v472_v9 = vld [vmem:[%s630_s1 + $0xd0] sm:$0xff]  }
   0x3   :  { %v465_v2 = vld [vmem:[%s630_s1] sm:$0xff]   ;;  %441 = vmatprep.subr.bf16.mxu1 %v464_v1  ;;  %v469_v6 = vld [vmem:[%s630_s1 + $0x8] sm:$0xff]   ;;  %v473_v10 = vld [vmem:[%s630_s1 + $0x10] sm:$0xff]  }
   0x4   :  { %v466_v3 = vld [vmem:[%s630_s1 + $0x80] sm:$0xff]   ;;  %420 = vmatpush3.bf16.msra.mxu0 %v465_v2  ;;  %v470_v7 = vld [vmem:[%s630_s1 + $0x88] sm:$0xff]   ;;  %v474_v11 = vld [vmem:[%s630_s1 + $0x90] sm:$0xff]  }
   0x5   :  { %442 = vmatpush3.bf16.msra.mxu1 %v466_v3  ;;  %421 = vmatprep.subr.bf16.mxu0 %v467_v4  ;;  %v475_v12 = vld [vmem:[%s630_s1 + $0x58] sm:$0xff]   ;;  %v479_v16 = vld [vmem:[%s630_s1 + $0x60] sm:$0xff]   ;;  %v483_v20 = vld [vmem:[%s630_s1 + $0x68] sm:$0xff]  }
   0x6   :  { %443 = vmatprep.subr.bf16.mxu1 %v468_v5  ;;  %v476_v13 = vld [vmem:[%s630_s1 + $0xd8] sm:$0xff]   ;;  %v480_v17 = vld [vmem:[%s630_s1 + $0xe0] sm:$0xff]   ;;  %v484_v21 = vld [vmem:[%s630_s1 + $0xe8] sm:$0xff]  }
   0x7   :  { %v477_v14 = vld [vmem:[%s630_s1 + $0x18] sm:$0xff]   ;;  %v481_v18 = vld [vmem:[%s630_s1 + $0x20] sm:$0xff]   ;;  %v485_v22 = vld [vmem:[%s630_s1 + $0x28] sm:$0xff]  }
   0x8   :  { %422 = vmatpush3.bf16.msra.mxu0 %v469_v6  ;;  %v478_v15 = vld [vmem:[%s630_s1 + $0x98] sm:$0xff]   ;;  %v482_v19 = vld [vmem:[%s630_s1 + $0xa0] sm:$0xff]   ;;  %v486_v23 = vld [vmem:[%s630_s1 + $0xa8] sm:$0xff]  }
   0x9   :  { %444 = vmatpush3.bf16.msra.mxu1 %v470_v7  ;;  %423 = vmatprep.subr.bf16.mxu0 %v471_v8  ;;  %v487_v24 = vld [vmem:[%s630_s1 + $0x70] sm:$0xff]   ;;  %v491_v28 = vld [vmem:[%s630_s1 + $0x78] sm:$0xff]  }
   0xa   :  { %445 = vmatprep.subr.bf16.mxu1 %v472_v9  ;;  %v488_v25 = vld [vmem:[%s630_s1 + $0xf0] sm:$0xff]   ;;  %v492_v29 = vld [vmem:[%s630_s1 + $0xf8] sm:$0xff]  }
   0xb   :  { %v489_v26 = vld [vmem:[%s630_s1 + $0x30] sm:$0xff]   ;;  %v493_v30 = vld [vmem:[%s630_s1 + $0x38] sm:$0xff]  }
   0xc   :  { %424 = vmatpush3.bf16.msra.mxu0 %v473_v10  ;;  %v490_v27 = vld [vmem:[%s630_s1 + $0xb0] sm:$0xff]   ;;  %v494_v31 = vld [vmem:[%s630_s1 + $0xb8] sm:$0xff]  }
   0xd   :  { %446 = vmatpush3.bf16.msra.mxu1 %v474_v11  ;;  %425 = vmatprep.subr.bf16.mxu0 %v475_v12  ;;  %v495_v32 = vld [vmem:[%s631_s0] ss:$16 sps:$4 sm:$0xff]   ;;  %v497_v33 = vld [vmem:[%s631_s0 + $0x4] ss:$16 sps:$4 sm:$0xff]   ;;  %v498_v34 = vld [vmem:[%s631_s0 + $0x8] ss:$16 sps:$4 sm:$0xff]  }
   0xe   :  { %447 = vmatprep.subr.bf16.mxu1 %v476_v13  ;;  %v500_v35 = vld [vmem:[%s631_s0 + $0xc] ss:$16 sps:$4 sm:$0xff]   ;;  %327 = vmatprep.mubr.bf16.mxu0 %v497_v33 }
   0xf   :  { %368 = vmatprep.mubr.bf16.mxu1 %v500_v35 }
  0x10   :  { %426 = vmatpush3.bf16.msra.mxu0 %v477_v14 }
  0x11   :  { %448 = vmatpush3.bf16.msra.mxu1 %v478_v15  ;;  %427 = vmatprep.subr.bf16.mxu0 %v479_v16 }
  0x12   :  { %449 = vmatprep.subr.bf16.mxu1 %v480_v17 }
  0x14   :  { %428 = vmatpush3.bf16.msra.mxu0 %v481_v18 }
  0x15   :  { %450 = vmatpush3.bf16.msra.mxu1 %v482_v19  ;;  %429 = vmatprep.subr.bf16.mxu0 %v483_v20 }
  0x16   :  { %451 = vmatprep.subr.bf16.mxu1 %v484_v21 }
  0x18   :  { %430 = vmatpush3.bf16.msra.mxu0 %v485_v22 }
  0x19   :  { %452 = vmatpush3.bf16.msra.mxu1 %v486_v23  ;;  %431 = vmatprep.subr.bf16.mxu0 %v487_v24 }
  0x1a   :  { %453 = vmatprep.subr.bf16.mxu1 %v488_v25 }
  0x1c   :  { %432 = vmatpush3.bf16.msra.mxu0 %v489_v26 }
  0x1d   :  { %454 = vmatpush3.bf16.msra.mxu1 %v490_v27  ;;  %433 = vmatprep.subr.bf16.mxu0 %v491_v28 }
  0x1e   :  { %455 = vmatprep.subr.bf16.mxu1 %v492_v29 }
  0x20   :  { %434 = vmatpush3.bf16.msra.mxu0 %v493_v30 }
  0x21   :  { %456 = vmatpush3.bf16.msra.mxu1 %v494_v31 }
  0x23   :  { %328 = vmatmul.mubr.bf16.vlgmr.msra.gmra.mrb[0].mxu0 %v495_v32 }
  0x24   :  { %369 = vmatmul.mubr.bf16.vlgmr.msra.gmra.mrb[0].mxu1 %v498_v34 }
  0xf6   :  { %v435_v36 = vpop.f32.mrb[0].mxu0 }
  0xf7   :  { %v457_v37 = vpop.f32.mrb[0].mxu1  ;;  %v436_v38 = vpop.f32.mrb[1].mxu0 }
  0xf8   :  { %v437_v39 = vadd.f32 %v436_v38, %v435_v36  ;;  %v458_v40 = vpop.f32.mrb[1].mxu1  ;;  %v438_v41 = vpop.f32.mrb[2].mxu0 }
  0xf9   :  { %v459_v42 = vadd.f32 %v458_v40, %v457_v37  ;;  %v460_v43 = vpop.f32.mrb[2].mxu1  ;;  %v439_v44 = vpop.f32.mrb[3].mxu0 }
  0xfa   :  { %v440_v45 = vadd.f32 %v439_v44, %v438_v41  ;;  %v461_v46 = vpop.f32.mrb[3].mxu1 }
  0xfb   :  { %v371_v47 = vadd.f32 %v459_v42, %v437_v39  ;;  %v462_v48 = vadd.f32 %v461_v46, %v460_v43 }
  0xfd   :  { %377 = vst [vmem:[%s632_s2] sm:$0xff] %v371_v47  ;;  %v374_v49 = vadd.f32 %v462_v48, %v440_v45 }
  0xff   :  { %378 = vst [vmem:[%s632_s2 + $0x8] sm:$0xff] %v374_v49 }

</bundles_post_ra>
